<compile_context>
chip_gen: v5e
topology: v5e:2x2
jax: 0.10.0
libtpu: 0.0.40
codegen_flags: <defaults>
</compile_context>

<pallas_src>
import math
from functools import partial

import jax
import jax.numpy as jnp
from jax.experimental import pallas as pl
from jax.experimental.pallas import tpu as pltpu

LN_EPS = 1e-5
NEG_INF = -1e9     # finite "minus infinity" for additive attention masks
_TILE = 512        # default K/N tile for linears and FFN stripe width


def _round_up(x, m):
    return ((x + m - 1) // m) * m


# ------------------------------------------------------------------------------------
# Tiled linear: y = act(x @ w + b), bf16 MXU, f32 accumulator, fused bias / relu.
# Weights arrive pre-padded to tile multiples and pre-cast to bf16 (prepare_params).
# ------------------------------------------------------------------------------------

def _linear_kernel(x_ref, w_ref, b_ref, o_ref, acc_ref, *, activation):
    k = pl.program_id(2)

    @pl.when(k == 0)
    def _():
        acc_ref[...] = jnp.zeros_like(acc_ref)

    acc_ref[...] += jnp.dot(x_ref[...].astype(jnp.bfloat16), w_ref[...],
                            preferred_element_type=jnp.float32)

    @pl.when(k == pl.num_programs(2) - 1)
    def _():
        y = acc_ref[...] + b_ref[...]
        if activation == "relu":
            y = jnp.maximum(y, 0.0)
        o_ref[...] = y.astype(o_ref.dtype)


def linear(x, w, b, n_out, activation=None, *, tm=512):
    """x: (M, K) f32, w: (Kp, Np) bf16 pre-padded, b: (1, Np) f32 pre-padded."""
    M, K = x.shape
    Kp, Np = w.shape
    tk = Kp if Kp <= _TILE else _TILE
    tn = Np if Np <= _TILE else _TILE
    tm = min(tm, _round_up(M, 8))
    Mp = _round_up(M, tm)
    if Mp != M or Kp != K:
        x = jnp.pad(x, ((0, Mp - M), (0, Kp - K)))

    out = pl.pallas_call(
        partial(_linear_kernel, activation=activation),
        out_shape=jax.ShapeDtypeStruct((Mp, Np), jnp.float32),
        grid=(Mp // tm, Np // tn, Kp // tk),
        in_specs=[pl.BlockSpec((tm, tk), lambda i, j, k: (i, k)),
                  pl.BlockSpec((tk, tn), lambda i, j, k: (k, j)),
                  pl.BlockSpec((1, tn), lambda i, j, k: (0, j))],
        out_specs=pl.BlockSpec((tm, tn), lambda i, j, k: (i, j)),
        scratch_shapes=[pltpu.VMEM((tm, tn), jnp.float32)],
        compiler_params=pltpu.CompilerParams(
            dimension_semantics=("parallel", "parallel", "arbitrary")),
    )(x, w, b)
    if Mp != M or Np != n_out:
        out = out[:M, :n_out]
    return out


# ------------------------------------------------------------------------------------
# Fused FFN + residual + LayerNorm:  out = LN(x + relu(x@w1+b1) @ w2 + b2)
# grid = (rows, ff-stripes); (M, dim_ff) intermediate never leaves VMEM.
# ------------------------------------------------------------------------------------

def _ffn_kernel(x_ref, w1_ref, b1_ref, w2_ref, b2_ref, g_ref, beta_ref, o_ref, acc_ref):
    f = pl.program_id(1)

    @pl.when(f == 0)
    def _():
        acc_ref[...] = jnp.zeros_like(acc_ref)

    h = jnp.dot(x_ref[...].astype(jnp.bfloat16), w1_ref[...],
                preferred_element_type=jnp.float32)
    h = jnp.maximum(h + b1_ref[...], 0.0)
    acc_ref[...] += jnp.dot(h.astype(jnp.bfloat16), w2_ref[...],
                            preferred_element_type=jnp.float32)

    @pl.when(f == pl.num_programs(1) - 1)
    def _():
        # residual (f32) + bias, then LayerNorm over the true model dim.
        y = acc_ref[...] + b2_ref[...] + x_ref[...]
        mu = jnp.mean(y, axis=-1, keepdims=True)
        yc = y - mu
        var = jnp.mean(yc * yc, axis=-1, keepdims=True)
        o_ref[...] = (yc * jax.lax.rsqrt(var + LN_EPS) * g_ref[...]
                      + beta_ref[...]).astype(o_ref.dtype)


def ffn_ln(x, fp, g, b, *, tm=256):
    """x: (M, D) f32; fp: prepared FFN params (bf16 weights, ff dim padded)."""
    M, D = x.shape
    Fp = fp["w1"].shape[1]
    tf = Fp if Fp <= _TILE else _TILE
    tm = min(tm, _round_up(M, 8))
    Mp = _round_up(M, tm)
    xp = jnp.pad(x, ((0, Mp - M), (0, 0))) if Mp != M else x

    out = pl.pallas_call(
        _ffn_kernel,
        out_shape=jax.ShapeDtypeStruct((Mp, D), jnp.float32),
        grid=(Mp // tm, Fp // tf),
        in_specs=[pl.BlockSpec((tm, D), lambda i, f: (i, 0)),
                  pl.BlockSpec((D, tf), lambda i, f: (0, f)),
                  pl.BlockSpec((1, tf), lambda i, f: (0, f)),
                  pl.BlockSpec((tf, D), lambda i, f: (f, 0)),
                  pl.BlockSpec((1, D), lambda i, f: (0, 0)),
                  pl.BlockSpec((1, D), lambda i, f: (0, 0)),
                  pl.BlockSpec((1, D), lambda i, f: (0, 0))],
        out_specs=pl.BlockSpec((tm, D), lambda i, f: (i, 0)),
        scratch_shapes=[pltpu.VMEM((tm, D), jnp.float32)],
        compiler_params=pltpu.CompilerParams(
            dimension_semantics=("parallel", "arbitrary")),
    )(xp, fp["w1"], fp["b1"], fp["w2"], fp["b2"], g, b)
    return out if Mp == M else out[:M]


# ------------------------------------------------------------------------------------
# LayerNorm (optionally with fused residual add, in f32).
# ------------------------------------------------------------------------------------

def _ln_body(xf, g_ref, b_ref, o_ref):
    mu = jnp.mean(xf, axis=-1, keepdims=True)
    xc = xf - mu
    var = jnp.mean(xc * xc, axis=-1, keepdims=True)
    o_ref[...] = (xc * jax.lax.rsqrt(var + LN_EPS) * g_ref[...] + b_ref[...]
                  ).astype(o_ref.dtype)


def _ln_kernel(x_ref, g_ref, b_ref, o_ref):
    _ln_body(x_ref[...].astype(jnp.float32), g_ref, b_ref, o_ref)


def _ln_res_kernel(x_ref, r_ref, g_ref, b_ref, o_ref):
    _ln_body(x_ref[...].astype(jnp.float32) + r_ref[...].astype(jnp.float32),
             g_ref, b_ref, o_ref)


def layer_norm(x, g, b, residual=None, *, tm=512):
    """LN(x) or LN(x + residual) over the last dim.  x: (M, D); g/b: (1, D)."""
    M, D = x.shape
    tm = min(tm, _round_up(M, 8))
    Mp = _round_up(M, tm)

    def pad_rows(a):
        return a if Mp == M else jnp.pad(a, ((0, Mp - M), (0, 0)))

    args = [pad_rows(x)]
    in_specs = [pl.BlockSpec((tm, D), lambda i: (i, 0))]
    kernel = _ln_kernel
    if residual is not None:
        args.append(pad_rows(residual))
        in_specs.append(pl.BlockSpec((tm, D), lambda i: (i, 0)))
        kernel = _ln_res_kernel
    args += [g, b]
    in_specs += [pl.BlockSpec((1, D), lambda i: (0, 0)),
                 pl.BlockSpec((1, D), lambda i: (0, 0))]

    out = pl.pallas_call(
        kernel,
        out_shape=jax.ShapeDtypeStruct((Mp, D), jnp.float32),
        grid=(Mp // tm,),
        in_specs=in_specs,
        out_specs=pl.BlockSpec((tm, D), lambda i: (i, 0)),
        compiler_params=pltpu.CompilerParams(dimension_semantics=("parallel",)),
    )(*args)
    return out if Mp == M else out[:M]


# ------------------------------------------------------------------------------------
# Flash-style multi-head attention.
# q/k/v: (B, H, S, Dh).  grid = (B, H, Sq//tq, Sk//tk), Sk axis last (online softmax).
# ------------------------------------------------------------------------------------

def _mha_kernel(*refs, has_mask, has_pad, scale, kv_len, tkv, mask_pad_cols):
    it = iter(refs)
    q_ref = next(it)
    k_ref = next(it)
    v_ref = next(it)
    mask_ref = next(it) if has_mask else None
    pad_ref = next(it) if has_pad else None
    o_ref = next(it)
    m_sc = next(it)
    l_sc = next(it)
    acc_sc = next(it)

    j = pl.program_id(3)

    @pl.when(j == 0)
    def _():
        m_sc[...] = jnp.full(m_sc.shape, -jnp.inf, jnp.float32)
        l_sc[...] = jnp.zeros_like(l_sc)
        acc_sc[...] = jnp.zeros_like(acc_sc)

    q = q_ref[0, 0].astype(jnp.bfloat16)                        # (tq, Dh)
    k = k_ref[0, 0].astype(jnp.bfloat16)                        # (tk, Dh)
    s = jax.lax.dot_general(q, k, dimension_numbers=(((1,), (1,)), ((), ())),
                            preferred_element_type=jnp.float32) * scale
    if has_mask:
        s = s + mask_ref[...]                                   # (tq, tk)
    if has_pad:
        s = s + pad_ref[0]                                      # (1, tk) broadcast
    if mask_pad_cols:                                           # keys beyond true Sk
        col = jax.lax.broadcasted_iota(jnp.int32, s.shape, 1) + j * tkv
        s = jnp.where(col < kv_len, s, NEG_INF)

    m_prev = m_sc[...]
    m_new = jnp.maximum(m_prev, jnp.max(s, axis=-1, keepdims=True))
    alpha = jnp.exp(m_prev - m_new)
    p = jnp.exp(s - m_new)
    l_sc[...] = alpha * l_sc[...] + jnp.sum(p, axis=-1, keepdims=True)
    acc_sc[...] = alpha * acc_sc[...] + jnp.dot(
        p.astype(jnp.bfloat16), v_ref[0, 0].astype(jnp.bfloat16),
        preferred_element_type=jnp.float32)
    m_sc[...] = m_new

    @pl.when(j == pl.num_programs(3) - 1)
    def _():
        # normalize after PV (EUP reciprocal on a (tq,1) vector).
        o_ref[0, 0] = (acc_sc[...] * pl.reciprocal(l_sc[...], approx=True)
                       ).astype(o_ref.dtype)


def mha(q, k, v, attn_mask, pad_bias, *, tq=256, tkv=256):
    """q: (B, H, Sq, Dh); k/v: (B, H, Sk, Dh); attn_mask: (Sq, Sk) f32 or None;
    pad_bias: (B, 1, Sk) f32 or None.  Returns (B, H, Sq, Dh) f32."""
    B, H, Sq, Dh = q.shape
    Sk = k.shape[2]
    scale = 1.0 / math.sqrt(Dh)

    tq = min(tq, _round_up(Sq, 8))
    tkv = min(tkv, _round_up(Sk, 8))
    Sqp = _round_up(Sq, tq)
    Skp = _round_up(Sk, tkv)

    def pad_axis(a, axis, target):
        if a.shape[axis] == target:
            return a
        pads = [(0, 0)] * a.ndim
        pads[axis] = (0, target - a.shape[axis])
        return jnp.pad(a, pads)

    qp = pad_axis(q, 2, Sqp)
    kp = pad_axis(k, 2, Skp)
    vp = pad_axis(v, 2, Skp)

    has_mask = attn_mask is not None
    has_pad = pad_bias is not None
    mask_pad_cols = (Skp != Sk)

    args = [qp, kp, vp]
    in_specs = [pl.BlockSpec((1, 1, tq, Dh), lambda b, h, i, j: (b, h, i, 0)),
                pl.BlockSpec((1, 1, tkv, Dh), lambda b, h, i, j: (b, h, j, 0)),
                pl.BlockSpec((1, 1, tkv, Dh), lambda b, h, i, j: (b, h, j, 0))]
    if has_mask:
        m = pad_axis(pad_axis(attn_mask, 0, Sqp), 1, Skp)
        args.append(m)
        in_specs.append(pl.BlockSpec((tq, tkv), lambda b, h, i, j: (i, j)))
    if has_pad:
        args.append(pad_axis(pad_bias, 2, Skp))
        in_specs.append(pl.BlockSpec((1, 1, tkv), lambda b, h, i, j: (b, 0, j)))

    out = pl.pallas_call(
        partial(_mha_kernel, has_mask=has_mask, has_pad=has_pad, scale=scale,
                kv_len=Sk, tkv=tkv, mask_pad_cols=mask_pad_cols),
        out_shape=jax.ShapeDtypeStruct((B, H, Sqp, Dh), jnp.float32),
        grid=(B, H, Sqp // tq, Skp // tkv),
        in_specs=in_specs,
        out_specs=pl.BlockSpec((1, 1, tq, Dh), lambda b, h, i, j: (b, h, i, 0)),
        scratch_shapes=[pltpu.VMEM((tq, 1), jnp.float32),
                        pltpu.VMEM((tq, 1), jnp.float32),
                        pltpu.VMEM((tq, Dh), jnp.float32)],
        compiler_params=pltpu.CompilerParams(
            dimension_semantics=("parallel", "parallel", "parallel", "arbitrary")),
    )(*args)
    return out if Sqp == Sq else out[:, :, :Sq]


# ------------------------------------------------------------------------------------
# Attention blocks + layer glue (plain JAX between kernels: layout plumbing only).
# ------------------------------------------------------------------------------------

def _attn_mask_f32(mask):
    if mask is None:
        return None
    if mask.dtype == jnp.bool_:                 # PyTorch bool mask: True = disallowed
        return jnp.where(mask, NEG_INF, 0.0).astype(jnp.float32)
    return mask.astype(jnp.float32)


def _pad_bias_f32(mask):
    if mask is None:
        return None
    B, S = mask.shape
    if mask.dtype == jnp.bool_:                 # True = ignore that key position
        return jnp.where(mask, NEG_INF, 0.0).astype(jnp.float32).reshape(B, 1, S)
    return mask.astype(jnp.float32).reshape(B, 1, S)


def self_attention(x2, B, S, D, ap, n_head, attn_mask, pad_bias):
    Dh = D // n_head
    qkv = linear(x2, ap["qkv"]["w"], ap["qkv"]["b"], 3 * D)          # fused Q/K/V proj
    qkv = jnp.transpose(qkv.reshape(B, S, 3, n_head, Dh), (2, 0, 3, 1, 4))
    o = mha(qkv[0], qkv[1], qkv[2], attn_mask, pad_bias)             # (B, H, S, Dh)
    o = jnp.transpose(o, (0, 2, 1, 3)).reshape(B * S, D)
    return linear(o, ap["out"]["w"], ap["out"]["b"], D)


def cross_attention(x2, memory, B, St, D, ap, n_head, pad_bias):
    Dh = D // n_head
    Ss = memory.shape[1]
    q = linear(x2, ap["q"]["w"], ap["q"]["b"], D)
    q = jnp.transpose(q.reshape(B, St, n_head, Dh), (0, 2, 1, 3))
    kv = linear(memory.reshape(B * Ss, D), ap["kv"]["w"], ap["kv"]["b"], 2 * D)
    kv = jnp.transpose(kv.reshape(B, Ss, 2, n_head, Dh), (2, 0, 3, 1, 4))
    o = mha(q, kv[0], kv[1], None, pad_bias)                          # no memory mask
    o = jnp.transpose(o, (0, 2, 1, 3)).reshape(B * St, D)
    return linear(o, ap["out"]["w"], ap["out"]["b"], D)


def encoder_layer(x, p, n_head, attn_mask, pad_bias):
    B, S, D = x.shape
    x2 = x.reshape(B * S, D)
    sa = self_attention(x2, B, S, D, p["attn"], n_head, attn_mask, pad_bias)
    x2 = layer_norm(x2, p["ln1_g"], p["ln1_b"], residual=sa)          # LN(x + attn)
    x2 = ffn_ln(x2, p["ffn"], p["ln2_g"], p["ln2_b"])                 # LN(x + FFN(x)) fused
    return x2.reshape(B, S, D)


def decoder_layer(x, memory, p, n_head, self_mask, self_pad, mem_pad):
    B, S, D = x.shape
    x2 = x.reshape(B * S, D)
    sa = self_attention(x2, B, S, D, p["self"], n_head, self_mask, self_pad)
    x2 = layer_norm(x2, p["ln1_g"], p["ln1_b"], residual=sa)
    ca = cross_attention(x2, memory, B, S, D, p["cross"], n_head, mem_pad)
    x2 = layer_norm(x2, p["ln2_g"], p["ln2_b"], residual=ca)
    x2 = ffn_ln(x2, p["ffn"], p["ln3_g"], p["ln3_b"])
    return x2.reshape(B, S, D)


def transformer_forward(params, src, trg, src_mask, tgt_mask,
                        src_padding_mask, tgt_padding_mask, memory_key_padding_mask,
                        *, n_head):
    d_model = params["pos"].shape[1]
    emb_scale = math.sqrt(d_model)
    B, Ss = src.shape
    St = trg.shape[1]

    # TokenEmbedding (* sqrt(d_model)) + PositionalEncoding; dropout == identity (eval).
    # TODO(synk): embedding gather + positional add kept in plain JAX (too small to kernel).
    src_e = params["src_emb"][src] * emb_scale + params["pos"][:Ss][None]
    tgt_e = params["tgt_emb"][trg] * emb_scale + params["pos"][:St][None]

    enc_mask = _attn_mask_f32(src_mask)
    enc_pad = _pad_bias_f32(src_padding_mask)
    mem = src_e
    for p in params["encoder_layers"]:
        mem = encoder_layer(mem, p, n_head, enc_mask, enc_pad)
    mem = layer_norm(mem.reshape(B * Ss, d_model),
                     params["enc_norm_g"], params["enc_norm_b"]).reshape(B, Ss, d_model)

    dec_mask = _attn_mask_f32(tgt_mask)
    dec_pad = _pad_bias_f32(tgt_padding_mask)
    mem_pad = _pad_bias_f32(memory_key_padding_mask)
    out = tgt_e
    for p in params["decoder_layers"]:
        out = decoder_layer(out, mem, p, n_head, dec_mask, dec_pad, mem_pad)
    out = layer_norm(out.reshape(B * St, d_model),
                     params["dec_norm_g"], params["dec_norm_b"])

    tgt_vocab = params["tgt_emb"].shape[0]
    logits = linear(out, params["gen"]["w"], params["gen"]["b"], tgt_vocab)
    return logits.reshape(B, St, tgt_vocab)


# ------------------------------------------------------------------------------------
# One-time parameter preparation: pad weights to tile multiples, cast to bf16,
# pre-reshape biases / LN params.  (Hoisted out of the per-call path.)
# ------------------------------------------------------------------------------------

def _prep_lin(w, b):
    K, N = w.shape
    tk = K if K <= _TILE else _TILE
    tn = N if N <= _TILE else _TILE
    Kp, Np = _round_up(K, tk), _round_up(N, tn)
    if (Kp, Np) != (K, N):
        w = jnp.pad(w, ((0, Kp - K), (0, Np - N)))
    if Np != N:
        b = jnp.pad(b, (0, Np - N))
    return {"w": w.astype(jnp.bfloat16), "b": b.reshape(1, Np).astype(jnp.float32)}


def _prep_ffn(w1, b1, w2, b2):
    D, F = w1.shape
    tf = F if F <= _TILE else _TILE
    Fp = _round_up(F, tf)
    if Fp != F:
        w1 = jnp.pad(w1, ((0, 0), (0, Fp - F)))
        b1 = jnp.pad(b1, (0, Fp - F))
        w2 = jnp.pad(w2, ((0, Fp - F), (0, 0)))
    return {"w1": w1.astype(jnp.bfloat16), "b1": b1.reshape(1, Fp).astype(jnp.float32),
            "w2": w2.astype(jnp.bfloat16), "b2": b2.reshape(1, D).astype(jnp.float32)}


def prepare_params(raw):
    D = raw["pos"].shape[1]

    def ln(g, b):
        return (g.reshape(1, D).astype(jnp.float32),
                b.reshape(1, D).astype(jnp.float32))

    def prep_self(a):
        return {"qkv": _prep_lin(a["w_qkv"], a["b_qkv"]),
                "out": _prep_lin(a["wo"], a["bo"])}

    def prep_cross(a):
        return {"q": _prep_lin(a["wq"], a["bq"]),
                "kv": _prep_lin(a["w_kv"], a["b_kv"]),
                "out": _prep_lin(a["wo"], a["bo"])}

    enc = []
    for p in raw["encoder_layers"]:
        lg1, lb1 = ln(p["ln1_g"], p["ln1_b"])
        lg2, lb2 = ln(p["ln2_g"], p["ln2_b"])
        enc.append({"attn": prep_self(p["self_attn"]),
                    "ln1_g": lg1, "ln1_b": lb1,
                    "ffn": _prep_ffn(p["w1"], p["b1"], p["w2"], p["b2"]),
                    "ln2_g": lg2, "ln2_b": lb2})
    dec = []
    for p in raw["decoder_layers"]:
        lg1, lb1 = ln(p["ln1_g"], p["ln1_b"])
        lg2, lb2 = ln(p["ln2_g"], p["ln2_b"])
        lg3, lb3 = ln(p["ln3_g"], p["ln3_b"])
        dec.append({"self": prep_self(p["self_attn"]),
                    "cross": prep_cross(p["cross_attn"]),
                    "ln1_g": lg1, "ln1_b": lb1, "ln2_g": lg2, "ln2_b": lb2,
                    "ffn": _prep_ffn(p["w1"], p["b1"], p["w2"], p["b2"]),
                    "ln3_g": lg3, "ln3_b": lb3})

    eg, eb = ln(raw["enc_norm_g"], raw["enc_norm_b"])
    dg, db = ln(raw["dec_norm_g"], raw["dec_norm_b"])
    return {"src_emb": raw["src_emb"], "tgt_emb": raw["tgt_emb"], "pos": raw["pos"],
            "encoder_layers": enc, "decoder_layers": dec,
            "enc_norm_g": eg, "enc_norm_b": eb, "dec_norm_g": dg, "dec_norm_b": db,
            "gen": _prep_lin(raw["gen_w"], raw["gen_b"])}


# ------------------------------------------------------------------------------------
# Deterministic parameter init (mirrors TransformerTorch.initialize()).
# ------------------------------------------------------------------------------------

def _xavier(key, shape):
    bound = math.sqrt(6.0 / (shape[0] + shape[1]))
    return jax.random.uniform(key, shape, jnp.float32, -bound, bound)


def make_pos_embedding(max_len, d_model):
    position = jnp.arange(max_len, dtype=jnp.float32)[:, None]
    div_term = jnp.exp(-jnp.arange(0, d_model, 2, dtype=jnp.float32)
                       * (math.log(10000.0) / d_model))
    pe = jnp.zeros((max_len, d_model), jnp.float32)
    pe = pe.at[:, 0::2].set(jnp.sin(position * div_term))
    pe = pe.at[:, 1::2].set(jnp.cos(position * div_term))
    return pe


def init_params(key, *, num_enc, num_dec, d_model, dim_ff,
                src_vocab, tgt_vocab, max_seq_len):
    keys = iter(jax.random.split(key, 512))

    def self_attn_params():
        return {"w_qkv": _xavier(next(keys), (d_model, 3 * d_model)),
                "b_qkv": jnp.zeros((3 * d_model,), jnp.float32),
                "wo": _xavier(next(keys), (d_model, d_model)),
                "bo": jnp.zeros((d_model,), jnp.float32)}

    def cross_attn_params():
        return {"wq": _xavier(next(keys), (d_model, d_model)),
                "bq": jnp.zeros((d_model,), jnp.float32),
                "w_kv": _xavier(next(keys), (d_model, 2 * d_model)),
                "b_kv": jnp.zeros((2 * d_model,), jnp.float32),
                "wo": _xavier(next(keys), (d_model, d_model)),
                "bo": jnp.zeros((d_model,), jnp.float32)}

    def enc_layer_params():
        return {"self_attn": self_attn_params(),
                "ln1_g": jnp.ones((d_model,)), "ln1_b": jnp.zeros((d_model,)),
                "w1": _xavier(next(keys), (d_model, dim_ff)), "b1": jnp.zeros((dim_ff,)),
                "w2": _xavier(next(keys), (dim_ff, d_model)), "b2": jnp.zeros((d_model,)),
                "ln2_g": jnp.ones((d_model,)), "ln2_b": jnp.zeros((d_model,))}

    def dec_layer_params():
        return {"self_attn": self_attn_params(), "cross_attn": cross_attn_params(),
                "ln1_g": jnp.ones((d_model,)), "ln1_b": jnp.zeros((d_model,)),
                "ln2_g": jnp.ones((d_model,)), "ln2_b": jnp.zeros((d_model,)),
                "w1": _xavier(next(keys), (d_model, dim_ff)), "b1": jnp.zeros((dim_ff,)),
                "w2": _xavier(next(keys), (dim_ff, d_model)), "b2": jnp.zeros((d_model,)),
                "ln3_g": jnp.ones((d_model,)), "ln3_b": jnp.zeros((d_model,))}

    return {
        "src_emb": _xavier(next(keys), (src_vocab, d_model)),
        "tgt_emb": _xavier(next(keys), (tgt_vocab, d_model)),
        "pos": make_pos_embedding(max_seq_len, d_model),
        "encoder_layers": [enc_layer_params() for _ in range(num_enc)],
        "decoder_layers": [dec_layer_params() for _ in range(num_dec)],
        "enc_norm_g": jnp.ones((d_model,)), "enc_norm_b": jnp.zeros((d_model,)),
        "dec_norm_g": jnp.ones((d_model,)), "dec_norm_b": jnp.zeros((d_model,)),
        "gen_w": _xavier(next(keys), (d_model, tgt_vocab)),
        "gen_b": jnp.zeros((tgt_vocab,), jnp.float32),
    }


# ------------------------------------------------------------------------------------
# Demo
# ------------------------------------------------------------------------------------

if __name__ == "__main__":
    # TODO(synk): dropout layers are identity here (inference mode).
    B, Ss, St = 2, 8, 8
    d_model, n_head, dim_ff = 32, 4, 64
    num_enc, num_dec = 2, 2
    src_vocab, tgt_vocab, max_seq_len = 50, 60, 100

    root = jax.random.PRNGKey(0)
    k_param, k_src, k_trg = jax.random.split(root, 3)
    raw = init_params(k_param, num_enc=num_enc, num_dec=num_dec, d_model=d_model,
                      dim_ff=dim_ff, src_vocab=src_vocab, tgt_vocab=tgt_vocab,
                      max_seq_len=max_seq_len)
    params = prepare_params(raw)   # one-time: pad to tile multiples + bf16 cast

    src = jax.random.randint(k_src, (B, Ss), 0, src_vocab, dtype=jnp.int32)
    trg = jax.random.randint(k_trg, (B, St), 0, tgt_vocab, dtype=jnp.int32)

    # src_mask: no masking; tgt_mask: causal (square subsequent mask), additive float.
    src_mask = jnp.zeros((Ss, Ss), jnp.float32)
    tgt_mask = jnp.where(jnp.triu(jnp.ones((St, St), bool), k=1),
                         NEG_INF, 0.0).astype(jnp.float32)

    # padding masks: True = ignore that key position (PyTorch convention).
    src_padding_mask = jnp.zeros((B, Ss), bool).at[0, Ss - 1].set(True)
    tgt_padding_mask = jnp.zeros((B, St), bool).at[1, St - 1].set(True)
    memory_key_padding_mask = src_padding_mask

    fwd = jax.jit(partial(transformer_forward, n_head=n_head))
    logits = jax.block_until_ready(
        fwd(params, src, trg, src_mask, tgt_mask,
            src_padding_mask, tgt_padding_mask, memory_key_padding_mask))

    assert logits.shape == (B, St, tgt_vocab)
    assert bool(jnp.all(jnp.isfinite(logits)))
    print("KERNEL_OK")
</pallas_src>

<mosaic_0001>
module attributes {stable_mosaic.version = 11 : i64} {
  func.func @_linear_kernel(%arg0: i32, %arg1: i32, %arg2: i32, %arg3: memref<16x32xf32, #tpu.memory_space<vmem>>, %arg4: memref<32x96xbf16, #tpu.memory_space<vmem>>, %arg5: memref<1x96xf32, #tpu.memory_space<vmem>>, %arg6: memref<16x96xf32, #tpu.memory_space<vmem>>, %arg7: memref<16x96xf32, #tpu.memory_space<vmem>>) attributes {dimension_semantics = [#tpu.dimension_semantics<parallel>, #tpu.dimension_semantics<parallel>, #tpu.dimension_semantics<arbitrary>], iteration_bounds = array<i64: 1, 1, 1>, scalar_prefetch = 0 : i64, scratch_operands = 1 : i64, tpu.core_type = #tpu.core_type<tc>, window_params = [{transform_indices = @transform_0, window_bounds = array<i64: 16, 32>}, {transform_indices = @transform_1, window_bounds = array<i64: 32, 96>}, {transform_indices = @transform_2, window_bounds = array<i64: 1, 96>}, {transform_indices = @transform_3, window_bounds = array<i64: 16, 96>}]} {
    %c0_i32 = arith.constant 0 : i32
    %0 = arith.cmpi eq, %arg2, %c0_i32 : i32
    %1 = arith.extui %0 : i1 to i32
    %c0_i32_0 = arith.constant 0 : i32
    %2 = arith.cmpi ne, %1, %c0_i32_0 : i32
    scf.if %2 {
      %cst_10 = arith.constant 0.000000e+00 : f32
      %13 = vector.broadcast %cst_10 : f32 to vector<16x96xf32>
      %c0_11 = arith.constant 0 : index
      %c0_12 = arith.constant 0 : index
      %14 = vector.load %arg7[%c0_11, %c0_12] : memref<16x96xf32, #tpu.memory_space<vmem>>, vector<16x96xf32>
      tpu.vector_store %arg7[%c0_11, %c0_12], %13 {strides = array<i32>} : memref<16x96xf32, #tpu.memory_space<vmem>>, vector<16x96xf32>,
    } else {
    }
    %c0 = arith.constant 0 : index
    %c0_1 = arith.constant 0 : index
    %3 = vector.load %arg7[%c0, %c0_1] : memref<16x96xf32, #tpu.memory_space<vmem>>, vector<16x96xf32>
    %c0_2 = arith.constant 0 : index
    %c0_3 = arith.constant 0 : index
    %4 = vector.load %arg3[%c0_2, %c0_3] : memref<16x32xf32, #tpu.memory_space<vmem>>, vector<16x32xf32>
    %5 = arith.truncf %4 : vector<16x32xf32> to vector<16x32xbf16>
    %c0_4 = arith.constant 0 : index
    %c0_5 = arith.constant 0 : index
    %6 = vector.load %arg4[%c0_4, %c0_5] : memref<32x96xbf16, #tpu.memory_space<vmem>>, vector<32x96xbf16>
    %cst = arith.constant dense<0.000000e+00> : vector<16x96xf32>
    %7 = tpu.matmul %5, %6, %cst {dimension_numbers = #tpu.dot_dimension_numbers<[1], [0], [0], [1], [0, 0, 1, 1], [], []>} : vector<16x32xbf16>, vector<32x96xbf16>, vector<16x96xf32> -> vector<16x96xf32>
    %8 = arith.addf %3, %7 : vector<16x96xf32>
    %c0_6 = arith.constant 0 : index
    %c0_7 = arith.constant 0 : index
    %9 = vector.load %arg7[%c0_6, %c0_7] : memref<16x96xf32, #tpu.memory_space<vmem>>, vector<16x96xf32>
    tpu.vector_store %arg7[%c0_6, %c0_7], %8 {strides = array<i32>} : memref<16x96xf32, #tpu.memory_space<vmem>>, vector<16x96xf32>,
    %c0_i32_8 = arith.constant 0 : i32
    %10 = arith.cmpi eq, %arg2, %c0_i32_8 : i32
    %11 = arith.extui %10 : i1 to i32
    %c0_i32_9 = arith.constant 0 : i32
    %12 = arith.cmpi ne, %11, %c0_i32_9 : i32
    scf.if %12 {
      %c0_10 = arith.constant 0 : index
      %c0_11 = arith.constant 0 : index
      %13 = vector.load %arg7[%c0_10, %c0_11] : memref<16x96xf32, #tpu.memory_space<vmem>>, vector<16x96xf32>
      %c0_12 = arith.constant 0 : index
      %c0_13 = arith.constant 0 : index
      %14 = vector.load %arg5[%c0_12, %c0_13] : memref<1x96xf32, #tpu.memory_space<vmem>>, vector<1x96xf32>
      %15 = vector.broadcast %14 : vector<1x96xf32> to vector<16x96xf32>
      %16 = arith.addf %13, %15 : vector<16x96xf32>
      %c0_14 = arith.constant 0 : index
      %c0_15 = arith.constant 0 : index
      %17 = vector.load %arg6[%c0_14, %c0_15] : memref<16x96xf32, #tpu.memory_space<vmem>>, vector<16x96xf32>
      tpu.vector_store %arg6[%c0_14, %c0_15], %16 {strides = array<i32>} : memref<16x96xf32, #tpu.memory_space<vmem>>, vector<16x96xf32>,
    } else {
    }
    return
  }
  func.func @transform_0(%arg0: i32, %arg1: i32, %arg2: i32) -> (i32, i32) {
    %c0_i32 = arith.constant 0 : i32
    return %arg0, %arg2 : i32, i32
  }
  func.func @transform_1(%arg0: i32, %arg1: i32, %arg2: i32) -> (i32, i32) {
    %c0_i32 = arith.constant 0 : i32
    return %arg2, %arg1 : i32, i32
  }
  func.func @transform_2(%arg0: i32, %arg1: i32, %arg2: i32) -> (i32, i32) {
    %c0_i32 = arith.constant 0 : i32
    %c0_i32_0 = arith.constant 0 : i32
    return %c0_i32, %arg1 : i32, i32
  }
  func.func @transform_3(%arg0: i32, %arg1: i32, %arg2: i32) -> (i32, i32) {
    %c0_i32 = arith.constant 0 : i32
    return %arg0, %arg1 : i32, i32
  }
}

module attributes {stable_mosaic.version = 11 : i64} {
  func.func @_mha_kernel(%arg0: i32, %arg1: i32, %arg2: i32, %arg3: i32, %arg4: memref<1x1x8x8xf32, #tpu.memory_space<vmem>>, %arg5: memref<1x1x8x8xf32, #tpu.memory_space<vmem>>, %arg6: memref<1x1x8x8xf32, #tpu.memory_space<vmem>>, %arg7: memref<8x8xf32, #tpu.memory_space<vmem>>, %arg8: memref<1x1x8xf32, #tpu.memory_space<vmem>>, %arg9: memref<1x1x8x8xf32, #tpu.memory_space<vmem>>, %arg10: memref<8x1xf32, #tpu.memory_space<vmem>>, %arg11: memref<8x1xf32, #tpu.memory_space<vmem>>, %arg12: memref<8x8xf32, #tpu.memory_space<vmem>>) attributes {dimension_semantics = [#tpu.dimension_semantics<parallel>, #tpu.dimension_semantics<parallel>, #tpu.dimension_semantics<parallel>, #tpu.dimension_semantics<arbitrary>], iteration_bounds = array<i64: 2, 4, 1, 1>, scalar_prefetch = 0 : i64, scratch_operands = 3 : i64, tpu.core_type = #tpu.core_type<tc>, window_params = [{transform_indices = @transform_0, window_bounds = array<i64: 1, 1, 8, 8>}, {transform_indices = @transform_1, window_bounds = array<i64: 1, 1, 8, 8>}, {transform_indices = @transform_2, window_bounds = array<i64: 1, 1, 8, 8>}, {transform_indices = @transform_3, window_bounds = array<i64: 8, 8>}, {transform_indices = @transform_4, window_bounds = array<i64: 1, 1, 8>}, {transform_indices = @transform_5, window_bounds = array<i64: 1, 1, 8, 8>}]} {
    %c0_i32 = arith.constant 0 : i32
    %0 = arith.cmpi eq, %arg3, %c0_i32 : i32
    %1 = arith.extui %0 : i1 to i32
    %c0_i32_0 = arith.constant 0 : i32
    %2 = arith.cmpi ne, %1, %c0_i32_0 : i32
    scf.if %2 {
      %cst_35 = arith.constant 0xFF800000 : f32
      %47 = vector.broadcast %cst_35 : f32 to vector<8x1xf32>
      %c0_36 = arith.constant 0 : index
      %c0_37 = arith.constant 0 : index
      %48 = vector.load %arg10[%c0_36, %c0_37] : memref<8x1xf32, #tpu.memory_space<vmem>>, vector<8x1xf32>
      tpu.vector_store %arg10[%c0_36, %c0_37], %47 {strides = array<i32>} : memref<8x1xf32, #tpu.memory_space<vmem>>, vector<8x1xf32>,
      %cst_38 = arith.constant 0.000000e+00 : f32
      %49 = vector.broadcast %cst_38 : f32 to vector<8x1xf32>
      %c0_39 = arith.constant 0 : index
      %c0_40 = arith.constant 0 : index
      %50 = vector.load %arg11[%c0_39, %c0_40] : memref<8x1xf32, #tpu.memory_space<vmem>>, vector<8x1xf32>
      tpu.vector_store %arg11[%c0_39, %c0_40], %49 {strides = array<i32>} : memref<8x1xf32, #tpu.memory_space<vmem>>, vector<8x1xf32>,
      %cst_41 = arith.constant 0.000000e+00 : f32
      %51 = vector.broadcast %cst_41 : f32 to vector<8x8xf32>
      %c0_42 = arith.constant 0 : index
      %c0_43 = arith.constant 0 : index
      %52 = vector.load %arg12[%c0_42, %c0_43] : memref<8x8xf32, #tpu.memory_space<vmem>>, vector<8x8xf32>
      tpu.vector_store %arg12[%c0_42, %c0_43], %51 {strides = array<i32>} : memref<8x8xf32, #tpu.memory_space<vmem>>, vector<8x8xf32>,
    } else {
    }
    %c0 = arith.constant 0 : index
    %c0_1 = arith.constant 0 : index
    %c0_2 = arith.constant 0 : index
    %c0_3 = arith.constant 0 : index
    %3 = vector.load %arg4[%c0, %c0_1, %c0_2, %c0_3] : memref<1x1x8x8xf32, #tpu.memory_space<vmem>>, vector<1x1x8x8xf32>
    %4 = vector.shape_cast %3 : vector<1x1x8x8xf32> to vector<8x8xf32>
    %5 = arith.truncf %4 : vector<8x8xf32> to vector<8x8xbf16>
    %c0_4 = arith.constant 0 : index
    %c0_5 = arith.constant 0 : index
    %c0_6 = arith.constant 0 : index
    %c0_7 = arith.constant 0 : index
    %6 = vector.load %arg5[%c0_4, %c0_5, %c0_6, %c0_7] : memref<1x1x8x8xf32, #tpu.memory_space<vmem>>, vector<1x1x8x8xf32>
    %7 = vector.shape_cast %6 : vector<1x1x8x8xf32> to vector<8x8xf32>
    %8 = arith.truncf %7 : vector<8x8xf32> to vector<8x8xbf16>
    %cst = arith.constant dense<0.000000e+00> : vector<8x8xf32>
    %9 = tpu.matmul %5, %8, %cst {dimension_numbers = #tpu.dot_dimension_numbers<[1], [1], [0], [0], [0, 0, 1, 0], [], []>} : vector<8x8xbf16>, vector<8x8xbf16>, vector<8x8xf32> -> vector<8x8xf32>
    %cst_8 = arith.constant 0.353553385 : f32
    %10 = vector.broadcast %cst_8 : f32 to vector<8x8xf32>
    %11 = arith.mulf %9, %10 : vector<8x8xf32>
    %c0_9 = arith.constant 0 : index
    %c0_10 = arith.constant 0 : index
    %12 = vector.load %arg7[%c0_9, %c0_10] : memref<8x8xf32, #tpu.memory_space<vmem>>, vector<8x8xf32>
    %13 = arith.addf %11, %12 : vector<8x8xf32>
    %c0_11 = arith.constant 0 : index
    %c0_12 = arith.constant 0 : index
    %c0_13 = arith.constant 0 : index
    %14 = vector.load %arg8[%c0_11, %c0_12, %c0_13] : memref<1x1x8xf32, #tpu.memory_space<vmem>>, vector<1x1x8xf32>
    %15 = vector.shape_cast %14 : vector<1x1x8xf32> to vector<1x8xf32>
    %16 = vector.broadcast %15 : vector<1x8xf32> to vector<8x8xf32>
    %17 = arith.addf %13, %16 : vector<8x8xf32>
    %c0_14 = arith.constant 0 : index
    %c0_15 = arith.constant 0 : index
    %18 = vector.load %arg10[%c0_14, %c0_15] : memref<8x1xf32, #tpu.memory_space<vmem>>, vector<8x1xf32>
    %cst_16 = arith.constant dense<0xFF800000> : vector<8xf32>
    %19 = vector.multi_reduction <maximumf>, %17, %cst_16 [1] : vector<8x8xf32> to vector<8xf32>
    %20 = vector.shape_cast %19 : vector<8xf32> to vector<8x1xf32>
    %21 = arith.maximumf %18, %20 : vector<8x1xf32>
    %22 = arith.subf %18, %21 : vector<8x1xf32>
    %23 = math.exp %22 : vector<8x1xf32>
    %24 = vector.broadcast %21 : vector<8x1xf32> to vector<8x8xf32>
    %25 = arith.subf %17, %24 : vector<8x8xf32>
    %26 = math.exp %25 : vector<8x8xf32>
    %c0_17 = arith.constant 0 : index
    %c0_18 = arith.constant 0 : index
    %27 = vector.load %arg11[%c0_17, %c0_18] : memref<8x1xf32, #tpu.memory_space<vmem>>, vector<8x1xf32>
    %28 = arith.mulf %23, %27 : vector<8x1xf32>
    %cst_19 = arith.constant dense<0.000000e+00> : vector<8xf32>
    %29 = vector.multi_reduction <add>, %26, %cst_19 [1] : vector<8x8xf32> to vector<8xf32>
    %30 = vector.shape_cast %29 : vector<8xf32> to vector<8x1xf32>
    %31 = arith.addf %28, %30 : vector<8x1xf32>
    %c0_20 = arith.constant 0 : index
    %c0_21 = arith.constant 0 : index
    %32 = vector.load %arg11[%c0_20, %c0_21] : memref<8x1xf32, #tpu.memory_space<vmem>>, vector<8x1xf32>
    tpu.vector_store %arg11[%c0_20, %c0_21], %31 {strides = array<i32>} : memref<8x1xf32, #tpu.memory_space<vmem>>, vector<8x1xf32>,
    %c0_22 = arith.constant 0 : index
    %c0_23 = arith.constant 0 : index
    %33 = vector.load %arg12[%c0_22, %c0_23] : memref<8x8xf32, #tpu.memory_space<vmem>>, vector<8x8xf32>
    %34 = vector.broadcast %23 : vector<8x1xf32> to vector<8x8xf32>
    %35 = arith.mulf %34, %33 : vector<8x8xf32>
    %36 = arith.truncf %26 : vector<8x8xf32> to vector<8x8xbf16>
    %c0_24 = arith.constant 0 : index
    %c0_25 = arith.constant 0 : index
    %c0_26 = arith.constant 0 : index
    %c0_27 = arith.constant 0 : index
    %37 = vector.load %arg6[%c0_24, %c0_25, %c0_26, %c0_27] : memref<1x1x8x8xf32, #tpu.memory_space<vmem>>, vector<1x1x8x8xf32>
    %38 = vector.shape_cast %37 : vector<1x1x8x8xf32> to vector<8x8xf32>
    %39 = arith.truncf %38 : vector<8x8xf32> to vector<8x8xbf16>
    %cst_28 = arith.constant dense<0.000000e+00> : vector<8x8xf32>
    %40 = tpu.matmul %36, %39, %cst_28 {dimension_numbers = #tpu.dot_dimension_numbers<[1], [0], [0], [1], [0, 0, 1, 1], [], []>} : vector<8x8xbf16>, vector<8x8xbf16>, vector<8x8xf32> -> vector<8x8xf32>
    %41 = arith.addf %35, %40 : vector<8x8xf32>
    %c0_29 = arith.constant 0 : index
    %c0_30 = arith.constant 0 : index
    %42 = vector.load %arg12[%c0_29, %c0_30] : memref<8x8xf32, #tpu.memory_space<vmem>>, vector<8x8xf32>
    tpu.vector_store %arg12[%c0_29, %c0_30], %41 {strides = array<i32>} : memref<8x8xf32, #tpu.memory_space<vmem>>, vector<8x8xf32>,
    %c0_31 = arith.constant 0 : index
    %c0_32 = arith.constant 0 : index
    %43 = vector.load %arg10[%c0_31, %c0_32] : memref<8x1xf32, #tpu.memory_space<vmem>>, vector<8x1xf32>
    tpu.vector_store %arg10[%c0_31, %c0_32], %21 {strides = array<i32>} : memref<8x1xf32, #tpu.memory_space<vmem>>, vector<8x1xf32>,
    %c0_i32_33 = arith.constant 0 : i32
    %44 = arith.cmpi eq, %arg3, %c0_i32_33 : i32
    %45 = arith.extui %44 : i1 to i32
    %c0_i32_34 = arith.constant 0 : i32
    %46 = arith.cmpi ne, %45, %c0_i32_34 : i32
    scf.if %46 {
      %c0_35 = arith.constant 0 : index
      %c0_36 = arith.constant 0 : index
      %47 = vector.load %arg12[%c0_35, %c0_36] : memref<8x8xf32, #tpu.memory_space<vmem>>, vector<8x8xf32>
      %c0_37 = arith.constant 0 : index
      %c0_38 = arith.constant 0 : index
      %48 = vector.load %arg11[%c0_37, %c0_38] : memref<8x1xf32, #tpu.memory_space<vmem>>, vector<8x1xf32>
      %49 = tpu.reciprocal %48 {approx = true} : vector<8x1xf32> -> vector<8x1xf32>
      %50 = vector.broadcast %49 : vector<8x1xf32> to vector<8x8xf32>
      %51 = arith.mulf %47, %50 : vector<8x8xf32>
      %c0_39 = arith.constant 0 : index
      %c0_40 = arith.constant 0 : index
      %c0_41 = arith.constant 0 : index
      %c0_42 = arith.constant 0 : index
      %52 = vector.load %arg9[%c0_39, %c0_40, %c0_41, %c0_42] : memref<1x1x8x8xf32, #tpu.memory_space<vmem>>, vector<1x1x8x8xf32>
      %53 = vector.shape_cast %52 : vector<1x1x8x8xf32> to vector<8x8xf32>
      %54 = vector.shape_cast %51 : vector<8x8xf32> to vector<1x1x8x8xf32>
      tpu.vector_store %arg9[%c0_39, %c0_40, %c0_41, %c0_42], %54 {strides = array<i32>} : memref<1x1x8x8xf32, #tpu.memory_space<vmem>>, vector<1x1x8x8xf32>,
    } else {
    }
    return
  }
  func.func @transform_0(%arg0: i32, %arg1: i32, %arg2: i32, %arg3: i32) -> (i32, i32, i32, i32) {
    %c0_i32 = arith.constant 0 : i32
    %c0_i32_0 = arith.constant 0 : i32
    return %arg0, %arg1, %arg2, %c0_i32 : i32, i32, i32, i32
  }
  func.func @transform_1(%arg0: i32, %arg1: i32, %arg2: i32, %arg3: i32) -> (i32, i32, i32, i32) {
    %c0_i32 = arith.constant 0 : i32
    %c0_i32_0 = arith.constant 0 : i32
    return %arg0, %arg1, %arg3, %c0_i32 : i32, i32, i32, i32
  }
  func.func @transform_2(%arg0: i32, %arg1: i32, %arg2: i32, %arg3: i32) -> (i32, i32, i32, i32) {
    %c0_i32 = arith.constant 0 : i32
    %c0_i32_0 = arith.constant 0 : i32
    return %arg0, %arg1, %arg3, %c0_i32 : i32, i32, i32, i32
  }
  func.func @transform_3(%arg0: i32, %arg1: i32, %arg2: i32, %arg3: i32) -> (i32, i32) {
    %c0_i32 = arith.constant 0 : i32
    return %arg2, %arg3 : i32, i32
  }
  func.func @transform_4(%arg0: i32, %arg1: i32, %arg2: i32, %arg3: i32) -> (i32, i32, i32) {
    %c0_i32 = arith.constant 0 : i32
    %c0_i32_0 = arith.constant 0 : i32
    return %arg0, %c0_i32, %arg3 : i32, i32, i32
  }
  func.func @transform_5(%arg0: i32, %arg1: i32, %arg2: i32, %arg3: i32) -> (i32, i32, i32, i32) {
    %c0_i32 = arith.constant 0 : i32
    %c0_i32_0 = arith.constant 0 : i32
    return %arg0, %arg1, %arg2, %c0_i32 : i32, i32, i32, i32
  }
}

module attributes {stable_mosaic.version = 11 : i64} {
  func.func @_linear_kernel(%arg0: i32, %arg1: i32, %arg2: i32, %arg3: memref<16x32xf32, #tpu.memory_space<vmem>>, %arg4: memref<32x32xbf16, #tpu.memory_space<vmem>>, %arg5: memref<1x32xf32, #tpu.memory_space<vmem>>, %arg6: memref<16x32xf32, #tpu.memory_space<vmem>>, %arg7: memref<16x32xf32, #tpu.memory_space<vmem>>) attributes {dimension_semantics = [#tpu.dimension_semantics<parallel>, #tpu.dimension_semantics<parallel>, #tpu.dimension_semantics<arbitrary>], iteration_bounds = array<i64: 1, 1, 1>, scalar_prefetch = 0 : i64, scratch_operands = 1 : i64, tpu.core_type = #tpu.core_type<tc>, window_params = [{transform_indices = @transform_0, window_bounds = array<i64: 16, 32>}, {transform_indices = @transform_1, window_bounds = array<i64: 32, 32>}, {transform_indices = @transform_2, window_bounds = array<i64: 1, 32>}, {transform_indices = @transform_3, window_bounds = array<i64: 16, 32>}]} {
    %c0_i32 = arith.constant 0 : i32
    %0 = arith.cmpi eq, %arg2, %c0_i32 : i32
    %1 = arith.extui %0 : i1 to i32
    %c0_i32_0 = arith.constant 0 : i32
    %2 = arith.cmpi ne, %1, %c0_i32_0 : i32
    scf.if %2 {
      %cst_10 = arith.constant 0.000000e+00 : f32
      %13 = vector.broadcast %cst_10 : f32 to vector<16x32xf32>
      %c0_11 = arith.constant 0 : index
      %c0_12 = arith.constant 0 : index
      %14 = vector.load %arg7[%c0_11, %c0_12] : memref<16x32xf32, #tpu.memory_space<vmem>>, vector<16x32xf32>
      tpu.vector_store %arg7[%c0_11, %c0_12], %13 {strides = array<i32>} : memref<16x32xf32, #tpu.memory_space<vmem>>, vector<16x32xf32>,
    } else {
    }
    %c0 = arith.constant 0 : index
    %c0_1 = arith.constant 0 : index
    %3 = vector.load %arg7[%c0, %c0_1] : memref<16x32xf32, #tpu.memory_space<vmem>>, vector<16x32xf32>
    %c0_2 = arith.constant 0 : index
    %c0_3 = arith.constant 0 : index
    %4 = vector.load %arg3[%c0_2, %c0_3] : memref<16x32xf32, #tpu.memory_space<vmem>>, vector<16x32xf32>
    %5 = arith.truncf %4 : vector<16x32xf32> to vector<16x32xbf16>
    %c0_4 = arith.constant 0 : index
    %c0_5 = arith.constant 0 : index
    %6 = vector.load %arg4[%c0_4, %c0_5] : memref<32x32xbf16, #tpu.memory_space<vmem>>, vector<32x32xbf16>
    %cst = arith.constant dense<0.000000e+00> : vector<16x32xf32>
    %7 = tpu.matmul %5, %6, %cst {dimension_numbers = #tpu.dot_dimension_numbers<[1], [0], [0], [1], [0, 0, 1, 1], [], []>} : vector<16x32xbf16>, vector<32x32xbf16>, vector<16x32xf32> -> vector<16x32xf32>
    %8 = arith.addf %3, %7 : vector<16x32xf32>
    %c0_6 = arith.constant 0 : index
    %c0_7 = arith.constant 0 : index
    %9 = vector.load %arg7[%c0_6, %c0_7] : memref<16x32xf32, #tpu.memory_space<vmem>>, vector<16x32xf32>
    tpu.vector_store %arg7[%c0_6, %c0_7], %8 {strides = array<i32>} : memref<16x32xf32, #tpu.memory_space<vmem>>, vector<16x32xf32>,
    %c0_i32_8 = arith.constant 0 : i32
    %10 = arith.cmpi eq, %arg2, %c0_i32_8 : i32
    %11 = arith.extui %10 : i1 to i32
    %c0_i32_9 = arith.constant 0 : i32
    %12 = arith.cmpi ne, %11, %c0_i32_9 : i32
    scf.if %12 {
      %c0_10 = arith.constant 0 : index
      %c0_11 = arith.constant 0 : index
      %13 = vector.load %arg7[%c0_10, %c0_11] : memref<16x32xf32, #tpu.memory_space<vmem>>, vector<16x32xf32>
      %c0_12 = arith.constant 0 : index
      %c0_13 = arith.constant 0 : index
      %14 = vector.load %arg5[%c0_12, %c0_13] : memref<1x32xf32, #tpu.memory_space<vmem>>, vector<1x32xf32>
      %15 = vector.broadcast %14 : vector<1x32xf32> to vector<16x32xf32>
      %16 = arith.addf %13, %15 : vector<16x32xf32>
      %c0_14 = arith.constant 0 : index
      %c0_15 = arith.constant 0 : index
      %17 = vector.load %arg6[%c0_14, %c0_15] : memref<16x32xf32, #tpu.memory_space<vmem>>, vector<16x32xf32>
      tpu.vector_store %arg6[%c0_14, %c0_15], %16 {strides = array<i32>} : memref<16x32xf32, #tpu.memory_space<vmem>>, vector<16x32xf32>,
    } else {
    }
    return
  }
  func.func @transform_0(%arg0: i32, %arg1: i32, %arg2: i32) -> (i32, i32) {
    %c0_i32 = arith.constant 0 : i32
    return %arg0, %arg2 : i32, i32
  }
  func.func @transform_1(%arg0: i32, %arg1: i32, %arg2: i32) -> (i32, i32) {
    %c0_i32 = arith.constant 0 : i32
    return %arg2, %arg1 : i32, i32
  }
  func.func @transform_2(%arg0: i32, %arg1: i32, %arg2: i32) -> (i32, i32) {
    %c0_i32 = arith.constant 0 : i32
    %c0_i32_0 = arith.constant 0 : i32
    return %c0_i32, %arg1 : i32, i32
  }
  func.func @transform_3(%arg0: i32, %arg1: i32, %arg2: i32) -> (i32, i32) {
    %c0_i32 = arith.constant 0 : i32
    return %arg0, %arg1 : i32, i32
  }
}

module attributes {stable_mosaic.version = 11 : i64} {
  func.func @_ln_res_kernel(%arg0: i32, %arg1: memref<16x32xf32, #tpu.memory_space<vmem>>, %arg2: memref<16x32xf32, #tpu.memory_space<vmem>>, %arg3: memref<1x32xf32, #tpu.memory_space<vmem>>, %arg4: memref<1x32xf32, #tpu.memory_space<vmem>>, %arg5: memref<16x32xf32, #tpu.memory_space<vmem>>) attributes {dimension_semantics = [#tpu.dimension_semantics<parallel>], iteration_bounds = array<i64: 1>, scalar_prefetch = 0 : i64, scratch_operands = 0 : i64, tpu.core_type = #tpu.core_type<tc>, window_params = [{transform_indices = @transform_0, window_bounds = array<i64: 16, 32>}, {transform_indices = @transform_1, window_bounds = array<i64: 16, 32>}, {pipeline_mode = #tpu.pipeline_mode<synchronous>, transform_indices = @transform_2, window_bounds = array<i64: 1, 32>}, {pipeline_mode = #tpu.pipeline_mode<synchronous>, transform_indices = @transform_3, window_bounds = array<i64: 1, 32>}, {transform_indices = @transform_4, window_bounds = array<i64: 16, 32>}]} {
    %c0 = arith.constant 0 : index
    %c0_0 = arith.constant 0 : index
    %0 = vector.load %arg1[%c0, %c0_0] : memref<16x32xf32, #tpu.memory_space<vmem>>, vector<16x32xf32>
    %c0_1 = arith.constant 0 : index
    %c0_2 = arith.constant 0 : index
    %1 = vector.load %arg2[%c0_1, %c0_2] : memref<16x32xf32, #tpu.memory_space<vmem>>, vector<16x32xf32>
    %2 = arith.addf %0, %1 : vector<16x32xf32>
    %cst = arith.constant dense<0.000000e+00> : vector<16xf32>
    %3 = vector.multi_reduction <add>, %2, %cst [1] : vector<16x32xf32> to vector<16xf32>
    %4 = vector.shape_cast %3 : vector<16xf32> to vector<16x1xf32>
    %cst_3 = arith.constant 3.200000e+01 : f32
    %5 = vector.broadcast %cst_3 : f32 to vector<16x1xf32>
    %6 = arith.divf %4, %5 : vector<16x1xf32>
    %7 = vector.broadcast %6 : vector<16x1xf32> to vector<16x32xf32>
    %8 = arith.subf %2, %7 : vector<16x32xf32>
    %9 = arith.mulf %8, %8 : vector<16x32xf32>
    %cst_4 = arith.constant dense<0.000000e+00> : vector<16xf32>
    %10 = vector.multi_reduction <add>, %9, %cst_4 [1] : vector<16x32xf32> to vector<16xf32>
    %11 = vector.shape_cast %10 : vector<16xf32> to vector<16x1xf32>
    %cst_5 = arith.constant 3.200000e+01 : f32
    %12 = vector.broadcast %cst_5 : f32 to vector<16x1xf32>
    %13 = arith.divf %11, %12 : vector<16x1xf32>
    %cst_6 = arith.constant 9.99999974E-6 : f32
    %14 = vector.broadcast %cst_6 : f32 to vector<16x1xf32>
    %15 = arith.addf %13, %14 : vector<16x1xf32>
    %16 = math.rsqrt %15 : vector<16x1xf32>
    %17 = vector.broadcast %16 : vector<16x1xf32> to vector<16x32xf32>
    %18 = arith.mulf %8, %17 : vector<16x32xf32>
    %c0_7 = arith.constant 0 : index
    %c0_8 = arith.constant 0 : index
    %19 = vector.load %arg3[%c0_7, %c0_8] : memref<1x32xf32, #tpu.memory_space<vmem>>, vector<1x32xf32>
    %20 = vector.broadcast %19 : vector<1x32xf32> to vector<16x32xf32>
    %21 = arith.mulf %18, %20 : vector<16x32xf32>
    %c0_9 = arith.constant 0 : index
    %c0_10 = arith.constant 0 : index
    %22 = vector.load %arg4[%c0_9, %c0_10] : memref<1x32xf32, #tpu.memory_space<vmem>>, vector<1x32xf32>
    %23 = vector.broadcast %22 : vector<1x32xf32> to vector<16x32xf32>
    %24 = arith.addf %21, %23 : vector<16x32xf32>
    %c0_11 = arith.constant 0 : index
    %c0_12 = arith.constant 0 : index
    %25 = vector.load %arg5[%c0_11, %c0_12] : memref<16x32xf32, #tpu.memory_space<vmem>>, vector<16x32xf32>
    tpu.vector_store %arg5[%c0_11, %c0_12], %24 {strides = array<i32>} : memref<16x32xf32, #tpu.memory_space<vmem>>, vector<16x32xf32>,
    return
  }
  func.func @transform_0(%arg0: i32) -> (i32, i32) {
    %c0_i32 = arith.constant 0 : i32
    %c0_i32_0 = arith.constant 0 : i32
    return %arg0, %c0_i32 : i32, i32
  }
  func.func @transform_1(%arg0: i32) -> (i32, i32) {
    %c0_i32 = arith.constant 0 : i32
    %c0_i32_0 = arith.constant 0 : i32
    return %arg0, %c0_i32 : i32, i32
  }
  func.func @transform_2(%arg0: i32) -> (i32, i32) {
    %c0_i32 = arith.constant 0 : i32
    %c0_i32_0 = arith.constant 0 : i32
    %c0_i32_1 = arith.constant 0 : i32
    return %c0_i32, %c0_i32_0 : i32, i32
  }
  func.func @transform_3(%arg0: i32) -> (i32, i32) {
    %c0_i32 = arith.constant 0 : i32
    %c0_i32_0 = arith.constant 0 : i32
    %c0_i32_1 = arith.constant 0 : i32
    return %c0_i32, %c0_i32_0 : i32, i32
  }
  func.func @transform_4(%arg0: i32) -> (i32, i32) {
    %c0_i32 = arith.constant 0 : i32
    %c0_i32_0 = arith.constant 0 : i32
    return %arg0, %c0_i32 : i32, i32
  }
}

module attributes {stable_mosaic.version = 11 : i64} {
  func.func @_ln_kernel(%arg0: i32, %arg1: memref<16x32xf32, #tpu.memory_space<vmem>>, %arg2: memref<1x32xf32, #tpu.memory_space<vmem>>, %arg3: memref<1x32xf32, #tpu.memory_space<vmem>>, %arg4: memref<16x32xf32, #tpu.memory_space<vmem>>) attributes {dimension_semantics = [#tpu.dimension_semantics<parallel>], iteration_bounds = array<i64: 1>, scalar_prefetch = 0 : i64, scratch_operands = 0 : i64, tpu.core_type = #tpu.core_type<tc>, window_params = [{transform_indices = @transform_0, window_bounds = array<i64: 16, 32>}, {pipeline_mode = #tpu.pipeline_mode<synchronous>, transform_indices = @transform_1, window_bounds = array<i64: 1, 32>}, {pipeline_mode = #tpu.pipeline_mode<synchronous>, transform_indices = @transform_2, window_bounds = array<i64: 1, 32>}, {transform_indices = @transform_3, window_bounds = array<i64: 16, 32>}]} {
    %c0 = arith.constant 0 : index
    %c0_0 = arith.constant 0 : index
    %0 = vector.load %arg1[%c0, %c0_0] : memref<16x32xf32, #tpu.memory_space<vmem>>, vector<16x32xf32>
    %cst = arith.constant dense<0.000000e+00> : vector<16xf32>
    %1 = vector.multi_reduction <add>, %0, %cst [1] : vector<16x32xf32> to vector<16xf32>
    %2 = vector.shape_cast %1 : vector<16xf32> to vector<16x1xf32>
    %cst_1 = arith.constant 3.200000e+01 : f32
    %3 = vector.broadcast %cst_1 : f32 to vector<16x1xf32>
    %4 = arith.divf %2, %3 : vector<16x1xf32>
    %5 = vector.broadcast %4 : vector<16x1xf32> to vector<16x32xf32>
    %6 = arith.subf %0, %5 : vector<16x32xf32>
    %7 = arith.mulf %6, %6 : vector<16x32xf32>
    %cst_2 = arith.constant dense<0.000000e+00> : vector<16xf32>
    %8 = vector.multi_reduction <add>, %7, %cst_2 [1] : vector<16x32xf32> to vector<16xf32>
    %9 = vector.shape_cast %8 : vector<16xf32> to vector<16x1xf32>
    %cst_3 = arith.constant 3.200000e+01 : f32
    %10 = vector.broadcast %cst_3 : f32 to vector<16x1xf32>
    %11 = arith.divf %9, %10 : vector<16x1xf32>
    %cst_4 = arith.constant 9.99999974E-6 : f32
    %12 = vector.broadcast %cst_4 : f32 to vector<16x1xf32>
    %13 = arith.addf %11, %12 : vector<16x1xf32>
    %14 = math.rsqrt %13 : vector<16x1xf32>
    %15 = vector.broadcast %14 : vector<16x1xf32> to vector<16x32xf32>
    %16 = arith.mulf %6, %15 : vector<16x32xf32>
    %c0_5 = arith.constant 0 : index
    %c0_6 = arith.constant 0 : index
    %17 = vector.load %arg2[%c0_5, %c0_6] : memref<1x32xf32, #tpu.memory_space<vmem>>, vector<1x32xf32>
    %18 = vector.broadcast %17 : vector<1x32xf32> to vector<16x32xf32>
    %19 = arith.mulf %16, %18 : vector<16x32xf32>
    %c0_7 = arith.constant 0 : index
    %c0_8 = arith.constant 0 : index
    %20 = vector.load %arg3[%c0_7, %c0_8] : memref<1x32xf32, #tpu.memory_space<vmem>>, vector<1x32xf32>
    %21 = vector.broadcast %20 : vector<1x32xf32> to vector<16x32xf32>
    %22 = arith.addf %19, %21 : vector<16x32xf32>
    %c0_9 = arith.constant 0 : index
    %c0_10 = arith.constant 0 : index
    %23 = vector.load %arg4[%c0_9, %c0_10] : memref<16x32xf32, #tpu.memory_space<vmem>>, vector<16x32xf32>
    tpu.vector_store %arg4[%c0_9, %c0_10], %22 {strides = array<i32>} : memref<16x32xf32, #tpu.memory_space<vmem>>, vector<16x32xf32>,
    return
  }
  func.func @transform_0(%arg0: i32) -> (i32, i32) {
    %c0_i32 = arith.constant 0 : i32
    %c0_i32_0 = arith.constant 0 : i32
    return %arg0, %c0_i32 : i32, i32
  }
  func.func @transform_1(%arg0: i32) -> (i32, i32) {
    %c0_i32 = arith.constant 0 : i32
    %c0_i32_0 = arith.constant 0 : i32
    %c0_i32_1 = arith.constant 0 : i32
    return %c0_i32, %c0_i32_0 : i32, i32
  }
  func.func @transform_2(%arg0: i32) -> (i32, i32) {
    %c0_i32 = arith.constant 0 : i32
    %c0_i32_0 = arith.constant 0 : i32
    %c0_i32_1 = arith.constant 0 : i32
    return %c0_i32, %c0_i32_0 : i32, i32
  }
  func.func @transform_3(%arg0: i32) -> (i32, i32) {
    %c0_i32 = arith.constant 0 : i32
    %c0_i32_0 = arith.constant 0 : i32
    return %arg0, %c0_i32 : i32, i32
  }
}

module attributes {stable_mosaic.version = 11 : i64} {
  func.func @_linear_kernel(%arg0: i32, %arg1: i32, %arg2: i32, %arg3: memref<16x32xf32, #tpu.memory_space<vmem>>, %arg4: memref<32x64xbf16, #tpu.memory_space<vmem>>, %arg5: memref<1x64xf32, #tpu.memory_space<vmem>>, %arg6: memref<16x64xf32, #tpu.memory_space<vmem>>, %arg7: memref<16x64xf32, #tpu.memory_space<vmem>>) attributes {dimension_semantics = [#tpu.dimension_semantics<parallel>, #tpu.dimension_semantics<parallel>, #tpu.dimension_semantics<arbitrary>], iteration_bounds = array<i64: 1, 1, 1>, scalar_prefetch = 0 : i64, scratch_operands = 1 : i64, tpu.core_type = #tpu.core_type<tc>, window_params = [{transform_indices = @transform_0, window_bounds = array<i64: 16, 32>}, {transform_indices = @transform_1, window_bounds = array<i64: 32, 64>}, {transform_indices = @transform_2, window_bounds = array<i64: 1, 64>}, {transform_indices = @transform_3, window_bounds = array<i64: 16, 64>}]} {
    %c0_i32 = arith.constant 0 : i32
    %0 = arith.cmpi eq, %arg2, %c0_i32 : i32
    %1 = arith.extui %0 : i1 to i32
    %c0_i32_0 = arith.constant 0 : i32
    %2 = arith.cmpi ne, %1, %c0_i32_0 : i32
    scf.if %2 {
      %cst_10 = arith.constant 0.000000e+00 : f32
      %13 = vector.broadcast %cst_10 : f32 to vector<16x64xf32>
      %c0_11 = arith.constant 0 : index
      %c0_12 = arith.constant 0 : index
      %14 = vector.load %arg7[%c0_11, %c0_12] : memref<16x64xf32, #tpu.memory_space<vmem>>, vector<16x64xf32>
      tpu.vector_store %arg7[%c0_11, %c0_12], %13 {strides = array<i32>} : memref<16x64xf32, #tpu.memory_space<vmem>>, vector<16x64xf32>,
    } else {
    }
    %c0 = arith.constant 0 : index
    %c0_1 = arith.constant 0 : index
    %3 = vector.load %arg7[%c0, %c0_1] : memref<16x64xf32, #tpu.memory_space<vmem>>, vector<16x64xf32>
    %c0_2 = arith.constant 0 : index
    %c0_3 = arith.constant 0 : index
    %4 = vector.load %arg3[%c0_2, %c0_3] : memref<16x32xf32, #tpu.memory_space<vmem>>, vector<16x32xf32>
    %5 = arith.truncf %4 : vector<16x32xf32> to vector<16x32xbf16>
    %c0_4 = arith.constant 0 : index
    %c0_5 = arith.constant 0 : index
    %6 = vector.load %arg4[%c0_4, %c0_5] : memref<32x64xbf16, #tpu.memory_space<vmem>>, vector<32x64xbf16>
    %cst = arith.constant dense<0.000000e+00> : vector<16x64xf32>
    %7 = tpu.matmul %5, %6, %cst {dimension_numbers = #tpu.dot_dimension_numbers<[1], [0], [0], [1], [0, 0, 1, 1], [], []>} : vector<16x32xbf16>, vector<32x64xbf16>, vector<16x64xf32> -> vector<16x64xf32>
    %8 = arith.addf %3, %7 : vector<16x64xf32>
    %c0_6 = arith.constant 0 : index
    %c0_7 = arith.constant 0 : index
    %9 = vector.load %arg7[%c0_6, %c0_7] : memref<16x64xf32, #tpu.memory_space<vmem>>, vector<16x64xf32>
    tpu.vector_store %arg7[%c0_6, %c0_7], %8 {strides = array<i32>} : memref<16x64xf32, #tpu.memory_space<vmem>>, vector<16x64xf32>,
    %c0_i32_8 = arith.constant 0 : i32
    %10 = arith.cmpi eq, %arg2, %c0_i32_8 : i32
    %11 = arith.extui %10 : i1 to i32
    %c0_i32_9 = arith.constant 0 : i32
    %12 = arith.cmpi ne, %11, %c0_i32_9 : i32
    scf.if %12 {
      %c0_10 = arith.constant 0 : index
      %c0_11 = arith.constant 0 : index
      %13 = vector.load %arg7[%c0_10, %c0_11] : memref<16x64xf32, #tpu.memory_space<vmem>>, vector<16x64xf32>
      %c0_12 = arith.constant 0 : index
      %c0_13 = arith.constant 0 : index
      %14 = vector.load %arg5[%c0_12, %c0_13] : memref<1x64xf32, #tpu.memory_space<vmem>>, vector<1x64xf32>
      %15 = vector.broadcast %14 : vector<1x64xf32> to vector<16x64xf32>
      %16 = arith.addf %13, %15 : vector<16x64xf32>
      %c0_14 = arith.constant 0 : index
      %c0_15 = arith.constant 0 : index
      %17 = vector.load %arg6[%c0_14, %c0_15] : memref<16x64xf32, #tpu.memory_space<vmem>>, vector<16x64xf32>
      tpu.vector_store %arg6[%c0_14, %c0_15], %16 {strides = array<i32>} : memref<16x64xf32, #tpu.memory_space<vmem>>, vector<16x64xf32>,
    } else {
    }
    return
  }
  func.func @transform_0(%arg0: i32, %arg1: i32, %arg2: i32) -> (i32, i32) {
    %c0_i32 = arith.constant 0 : i32
    return %arg0, %arg2 : i32, i32
  }
  func.func @transform_1(%arg0: i32, %arg1: i32, %arg2: i32) -> (i32, i32) {
    %c0_i32 = arith.constant 0 : i32
    return %arg2, %arg1 : i32, i32
  }
  func.func @transform_2(%arg0: i32, %arg1: i32, %arg2: i32) -> (i32, i32) {
    %c0_i32 = arith.constant 0 : i32
    %c0_i32_0 = arith.constant 0 : i32
    return %c0_i32, %arg1 : i32, i32
  }
  func.func @transform_3(%arg0: i32, %arg1: i32, %arg2: i32) -> (i32, i32) {
    %c0_i32 = arith.constant 0 : i32
    return %arg0, %arg1 : i32, i32
  }
}

module attributes {stable_mosaic.version = 11 : i64} {
  func.func @_ffn_kernel(%arg0: i32, %arg1: i32, %arg2: memref<16x32xf32, #tpu.memory_space<vmem>>, %arg3: memref<32x64xbf16, #tpu.memory_space<vmem>>, %arg4: memref<1x64xf32, #tpu.memory_space<vmem>>, %arg5: memref<64x32xbf16, #tpu.memory_space<vmem>>, %arg6: memref<1x32xf32, #tpu.memory_space<vmem>>, %arg7: memref<1x32xf32, #tpu.memory_space<vmem>>, %arg8: memref<1x32xf32, #tpu.memory_space<vmem>>, %arg9: memref<16x32xf32, #tpu.memory_space<vmem>>, %arg10: memref<16x32xf32, #tpu.memory_space<vmem>>) attributes {dimension_semantics = [#tpu.dimension_semantics<parallel>, #tpu.dimension_semantics<arbitrary>], iteration_bounds = array<i64: 1, 1>, scalar_prefetch = 0 : i64, scratch_operands = 1 : i64, tpu.core_type = #tpu.core_type<tc>, window_params = [{transform_indices = @transform_0, window_bounds = array<i64: 16, 32>}, {transform_indices = @transform_1, window_bounds = array<i64: 32, 64>}, {transform_indices = @transform_2, window_bounds = array<i64: 1, 64>}, {transform_indices = @transform_3, window_bounds = array<i64: 64, 32>}, {pipeline_mode = #tpu.pipeline_mode<synchronous>, transform_indices = @transform_4, window_bounds = array<i64: 1, 32>}, {pipeline_mode = #tpu.pipeline_mode<synchronous>, transform_indices = @transform_5, window_bounds = array<i64: 1, 32>}, {pipeline_mode = #tpu.pipeline_mode<synchronous>, transform_indices = @transform_6, window_bounds = array<i64: 1, 32>}, {transform_indices = @transform_7, window_bounds = array<i64: 16, 32>}]} {
    %c0_i32 = arith.constant 0 : i32
    %0 = arith.cmpi eq, %arg1, %c0_i32 : i32
    %1 = arith.extui %0 : i1 to i32
    %c0_i32_0 = arith.constant 0 : i32
    %2 = arith.cmpi ne, %1, %c0_i32_0 : i32
    scf.if %2 {
      %cst_16 = arith.constant 0.000000e+00 : f32
      %21 = vector.broadcast %cst_16 : f32 to vector<16x32xf32>
      %c0_17 = arith.constant 0 : index
      %c0_18 = arith.constant 0 : index
      %22 = vector.load %arg10[%c0_17, %c0_18] : memref<16x32xf32, #tpu.memory_space<vmem>>, vector<16x32xf32>
      tpu.vector_store %arg10[%c0_17, %c0_18], %21 {strides = array<i32>} : memref<16x32xf32, #tpu.memory_space<vmem>>, vector<16x32xf32>,
    } else {
    }
    %c0 = arith.constant 0 : index
    %c0_1 = arith.constant 0 : index
    %3 = vector.load %arg2[%c0, %c0_1] : memref<16x32xf32, #tpu.memory_space<vmem>>, vector<16x32xf32>
    %4 = arith.truncf %3 : vector<16x32xf32> to vector<16x32xbf16>
    %c0_2 = arith.constant 0 : index
    %c0_3 = arith.constant 0 : index
    %5 = vector.load %arg3[%c0_2, %c0_3] : memref<32x64xbf16, #tpu.memory_space<vmem>>, vector<32x64xbf16>
    %cst = arith.constant dense<0.000000e+00> : vector<16x64xf32>
    %6 = tpu.matmul %4, %5, %cst {dimension_numbers = #tpu.dot_dimension_numbers<[1], [0], [0], [1], [0, 0, 1, 1], [], []>} : vector<16x32xbf16>, vector<32x64xbf16>, vector<16x64xf32> -> vector<16x64xf32>
    %c0_4 = arith.constant 0 : index
    %c0_5 = arith.constant 0 : index
    %7 = vector.load %arg4[%c0_4, %c0_5] : memref<1x64xf32, #tpu.memory_space<vmem>>, vector<1x64xf32>
    %8 = vector.broadcast %7 : vector<1x64xf32> to vector<16x64xf32>
    %9 = arith.addf %6, %8 : vector<16x64xf32>
    %cst_6 = arith.constant 0.000000e+00 : f32
    %10 = vector.broadcast %cst_6 : f32 to vector<16x64xf32>
    %11 = arith.maximumf %9, %10 : vector<16x64xf32>
    %c0_7 = arith.constant 0 : index
    %c0_8 = arith.constant 0 : index
    %12 = vector.load %arg10[%c0_7, %c0_8] : memref<16x32xf32, #tpu.memory_space<vmem>>, vector<16x32xf32>
    %13 = arith.truncf %11 : vector<16x64xf32> to vector<16x64xbf16>
    %c0_9 = arith.constant 0 : index
    %c0_10 = arith.constant 0 : index
    %14 = vector.load %arg5[%c0_9, %c0_10] : memref<64x32xbf16, #tpu.memory_space<vmem>>, vector<64x32xbf16>
    %cst_11 = arith.constant dense<0.000000e+00> : vector<16x32xf32>
    %15 = tpu.matmul %13, %14, %cst_11 {dimension_numbers = #tpu.dot_dimension_numbers<[1], [0], [0], [1], [0, 0, 1, 1], [], []>} : vector<16x64xbf16>, vector<64x32xbf16>, vector<16x32xf32> -> vector<16x32xf32>
    %16 = arith.addf %12, %15 : vector<16x32xf32>
    %c0_12 = arith.constant 0 : index
    %c0_13 = arith.constant 0 : index
    %17 = vector.load %arg10[%c0_12, %c0_13] : memref<16x32xf32, #tpu.memory_space<vmem>>, vector<16x32xf32>
    tpu.vector_store %arg10[%c0_12, %c0_13], %16 {strides = array<i32>} : memref<16x32xf32, #tpu.memory_space<vmem>>, vector<16x32xf32>,
    %c0_i32_14 = arith.constant 0 : i32
    %18 = arith.cmpi eq, %arg1, %c0_i32_14 : i32
    %19 = arith.extui %18 : i1 to i32
    %c0_i32_15 = arith.constant 0 : i32
    %20 = arith.cmpi ne, %19, %c0_i32_15 : i32
    scf.if %20 {
      %c0_16 = arith.constant 0 : index
      %c0_17 = arith.constant 0 : index
      %21 = vector.load %arg10[%c0_16, %c0_17] : memref<16x32xf32, #tpu.memory_space<vmem>>, vector<16x32xf32>
      %c0_18 = arith.constant 0 : index
      %c0_19 = arith.constant 0 : index
      %22 = vector.load %arg6[%c0_18, %c0_19] : memref<1x32xf32, #tpu.memory_space<vmem>>, vector<1x32xf32>
      %23 = vector.broadcast %22 : vector<1x32xf32> to vector<16x32xf32>
      %24 = arith.addf %21, %23 : vector<16x32xf32>
      %c0_20 = arith.constant 0 : index
      %c0_21 = arith.constant 0 : index
      %25 = vector.load %arg2[%c0_20, %c0_21] : memref<16x32xf32, #tpu.memory_space<vmem>>, vector<16x32xf32>
      %26 = arith.addf %24, %25 : vector<16x32xf32>
      %cst_22 = arith.constant dense<0.000000e+00> : vector<16xf32>
      %27 = vector.multi_reduction <add>, %26, %cst_22 [1] : vector<16x32xf32> to vector<16xf32>
      %28 = vector.shape_cast %27 : vector<16xf32> to vector<16x1xf32>
      %cst_23 = arith.constant 3.200000e+01 : f32
      %29 = vector.broadcast %cst_23 : f32 to vector<16x1xf32>
      %30 = arith.divf %28, %29 : vector<16x1xf32>
      %31 = vector.broadcast %30 : vector<16x1xf32> to vector<16x32xf32>
      %32 = arith.subf %26, %31 : vector<16x32xf32>
      %33 = arith.mulf %32, %32 : vector<16x32xf32>
      %cst_24 = arith.constant dense<0.000000e+00> : vector<16xf32>
      %34 = vector.multi_reduction <add>, %33, %cst_24 [1] : vector<16x32xf32> to vector<16xf32>
      %35 = vector.shape_cast %34 : vector<16xf32> to vector<16x1xf32>
      %cst_25 = arith.constant 3.200000e+01 : f32
      %36 = vector.broadcast %cst_25 : f32 to vector<16x1xf32>
      %37 = arith.divf %35, %36 : vector<16x1xf32>
      %cst_26 = arith.constant 9.99999974E-6 : f32
      %38 = vector.broadcast %cst_26 : f32 to vector<16x1xf32>
      %39 = arith.addf %37, %38 : vector<16x1xf32>
      %40 = math.rsqrt %39 : vector<16x1xf32>
      %41 = vector.broadcast %40 : vector<16x1xf32> to vector<16x32xf32>
      %42 = arith.mulf %32, %41 : vector<16x32xf32>
      %c0_27 = arith.constant 0 : index
      %c0_28 = arith.constant 0 : index
      %43 = vector.load %arg7[%c0_27, %c0_28] : memref<1x32xf32, #tpu.memory_space<vmem>>, vector<1x32xf32>
      %44 = vector.broadcast %43 : vector<1x32xf32> to vector<16x32xf32>
      %45 = arith.mulf %42, %44 : vector<16x32xf32>
      %c0_29 = arith.constant 0 : index
      %c0_30 = arith.constant 0 : index
      %46 = vector.load %arg8[%c0_29, %c0_30] : memref<1x32xf32, #tpu.memory_space<vmem>>, vector<1x32xf32>
      %47 = vector.broadcast %46 : vector<1x32xf32> to vector<16x32xf32>
      %48 = arith.addf %45, %47 : vector<16x32xf32>
      %c0_31 = arith.constant 0 : index
      %c0_32 = arith.constant 0 : index
      %49 = vector.load %arg9[%c0_31, %c0_32] : memref<16x32xf32, #tpu.memory_space<vmem>>, vector<16x32xf32>
      tpu.vector_store %arg9[%c0_31, %c0_32], %48 {strides = array<i32>} : memref<16x32xf32, #tpu.memory_space<vmem>>, vector<16x32xf32>,
    } else {
    }
    return
  }
  func.func @transform_0(%arg0: i32, %arg1: i32) -> (i32, i32) {
    %c0_i32 = arith.constant 0 : i32
    %c0_i32_0 = arith.constant 0 : i32
    return %arg0, %c0_i32 : i32, i32
  }
  func.func @transform_1(%arg0: i32, %arg1: i32) -> (i32, i32) {
    %c0_i32 = arith.constant 0 : i32
    %c0_i32_0 = arith.constant 0 : i32
    return %c0_i32, %arg1 : i32, i32
  }
  func.func @transform_2(%arg0: i32, %arg1: i32) -> (i32, i32) {
    %c0_i32 = arith.constant 0 : i32
    %c0_i32_0 = arith.constant 0 : i32
    return %c0_i32, %arg1 : i32, i32
  }
  func.func @transform_3(%arg0: i32, %arg1: i32) -> (i32, i32) {
    %c0_i32 = arith.constant 0 : i32
    %c0_i32_0 = arith.constant 0 : i32
    return %arg1, %c0_i32 : i32, i32
  }
  func.func @transform_4(%arg0: i32, %arg1: i32) -> (i32, i32) {
    %c0_i32 = arith.constant 0 : i32
    %c0_i32_0 = arith.constant 0 : i32
    %c0_i32_1 = arith.constant 0 : i32
    return %c0_i32, %c0_i32_0 : i32, i32
  }
  func.func @transform_5(%arg0: i32, %arg1: i32) -> (i32, i32) {
    %c0_i32 = arith.constant 0 : i32
    %c0_i32_0 = arith.constant 0 : i32
    %c0_i32_1 = arith.constant 0 : i32
    return %c0_i32, %c0_i32_0 : i32, i32
  }
  func.func @transform_6(%arg0: i32, %arg1: i32) -> (i32, i32) {
    %c0_i32 = arith.constant 0 : i32
    %c0_i32_0 = arith.constant 0 : i32
    %c0_i32_1 = arith.constant 0 : i32
    return %c0_i32, %c0_i32_0 : i32, i32
  }
  func.func @transform_7(%arg0: i32, %arg1: i32) -> (i32, i32) {
    %c0_i32 = arith.constant 0 : i32
    %c0_i32_0 = arith.constant 0 : i32
    return %arg0, %c0_i32 : i32, i32
  }
}

module attributes {stable_mosaic.version = 11 : i64} {
  func.func @_mha_kernel(%arg0: i32, %arg1: i32, %arg2: i32, %arg3: i32, %arg4: memref<1x1x8x8xf32, #tpu.memory_space<vmem>>, %arg5: memref<1x1x8x8xf32, #tpu.memory_space<vmem>>, %arg6: memref<1x1x8x8xf32, #tpu.memory_space<vmem>>, %arg7: memref<1x1x8xf32, #tpu.memory_space<vmem>>, %arg8: memref<1x1x8x8xf32, #tpu.memory_space<vmem>>, %arg9: memref<8x1xf32, #tpu.memory_space<vmem>>, %arg10: memref<8x1xf32, #tpu.memory_space<vmem>>, %arg11: memref<8x8xf32, #tpu.memory_space<vmem>>) attributes {dimension_semantics = [#tpu.dimension_semantics<parallel>, #tpu.dimension_semantics<parallel>, #tpu.dimension_semantics<parallel>, #tpu.dimension_semantics<arbitrary>], iteration_bounds = array<i64: 2, 4, 1, 1>, scalar_prefetch = 0 : i64, scratch_operands = 3 : i64, tpu.core_type = #tpu.core_type<tc>, window_params = [{transform_indices = @transform_0, window_bounds = array<i64: 1, 1, 8, 8>}, {transform_indices = @transform_1, window_bounds = array<i64: 1, 1, 8, 8>}, {transform_indices = @transform_2, window_bounds = array<i64: 1, 1, 8, 8>}, {transform_indices = @transform_3, window_bounds = array<i64: 1, 1, 8>}, {transform_indices = @transform_4, window_bounds = array<i64: 1, 1, 8, 8>}]} {
    %c0_i32 = arith.constant 0 : i32
    %0 = arith.cmpi eq, %arg3, %c0_i32 : i32
    %1 = arith.extui %0 : i1 to i32
    %c0_i32_0 = arith.constant 0 : i32
    %2 = arith.cmpi ne, %1, %c0_i32_0 : i32
    scf.if %2 {
      %cst_33 = arith.constant 0xFF800000 : f32
      %45 = vector.broadcast %cst_33 : f32 to vector<8x1xf32>
      %c0_34 = arith.constant 0 : index
      %c0_35 = arith.constant 0 : index
      %46 = vector.load %arg9[%c0_34, %c0_35] : memref<8x1xf32, #tpu.memory_space<vmem>>, vector<8x1xf32>
      tpu.vector_store %arg9[%c0_34, %c0_35], %45 {strides = array<i32>} : memref<8x1xf32, #tpu.memory_space<vmem>>, vector<8x1xf32>,
      %cst_36 = arith.constant 0.000000e+00 : f32
      %47 = vector.broadcast %cst_36 : f32 to vector<8x1xf32>
      %c0_37 = arith.constant 0 : index
      %c0_38 = arith.constant 0 : index
      %48 = vector.load %arg10[%c0_37, %c0_38] : memref<8x1xf32, #tpu.memory_space<vmem>>, vector<8x1xf32>
      tpu.vector_store %arg10[%c0_37, %c0_38], %47 {strides = array<i32>} : memref<8x1xf32, #tpu.memory_space<vmem>>, vector<8x1xf32>,
      %cst_39 = arith.constant 0.000000e+00 : f32
      %49 = vector.broadcast %cst_39 : f32 to vector<8x8xf32>
      %c0_40 = arith.constant 0 : index
      %c0_41 = arith.constant 0 : index
      %50 = vector.load %arg11[%c0_40, %c0_41] : memref<8x8xf32, #tpu.memory_space<vmem>>, vector<8x8xf32>
      tpu.vector_store %arg11[%c0_40, %c0_41], %49 {strides = array<i32>} : memref<8x8xf32, #tpu.memory_space<vmem>>, vector<8x8xf32>,
    } else {
    }
    %c0 = arith.constant 0 : index
    %c0_1 = arith.constant 0 : index
    %c0_2 = arith.constant 0 : index
    %c0_3 = arith.constant 0 : index
    %3 = vector.load %arg4[%c0, %c0_1, %c0_2, %c0_3] : memref<1x1x8x8xf32, #tpu.memory_space<vmem>>, vector<1x1x8x8xf32>
    %4 = vector.shape_cast %3 : vector<1x1x8x8xf32> to vector<8x8xf32>
    %5 = arith.truncf %4 : vector<8x8xf32> to vector<8x8xbf16>
    %c0_4 = arith.constant 0 : index
    %c0_5 = arith.constant 0 : index
    %c0_6 = arith.constant 0 : index
    %c0_7 = arith.constant 0 : index
    %6 = vector.load %arg5[%c0_4, %c0_5, %c0_6, %c0_7] : memref<1x1x8x8xf32, #tpu.memory_space<vmem>>, vector<1x1x8x8xf32>
    %7 = vector.shape_cast %6 : vector<1x1x8x8xf32> to vector<8x8xf32>
    %8 = arith.truncf %7 : vector<8x8xf32> to vector<8x8xbf16>
    %cst = arith.constant dense<0.000000e+00> : vector<8x8xf32>
    %9 = tpu.matmul %5, %8, %cst {dimension_numbers = #tpu.dot_dimension_numbers<[1], [1], [0], [0], [0, 0, 1, 0], [], []>} : vector<8x8xbf16>, vector<8x8xbf16>, vector<8x8xf32> -> vector<8x8xf32>
    %cst_8 = arith.constant 0.353553385 : f32
    %10 = vector.broadcast %cst_8 : f32 to vector<8x8xf32>
    %11 = arith.mulf %9, %10 : vector<8x8xf32>
    %c0_9 = arith.constant 0 : index
    %c0_10 = arith.constant 0 : index
    %c0_11 = arith.constant 0 : index
    %12 = vector.load %arg7[%c0_9, %c0_10, %c0_11] : memref<1x1x8xf32, #tpu.memory_space<vmem>>, vector<1x1x8xf32>
    %13 = vector.shape_cast %12 : vector<1x1x8xf32> to vector<1x8xf32>
    %14 = vector.broadcast %13 : vector<1x8xf32> to vector<8x8xf32>
    %15 = arith.addf %11, %14 : vector<8x8xf32>
    %c0_12 = arith.constant 0 : index
    %c0_13 = arith.constant 0 : index
    %16 = vector.load %arg9[%c0_12, %c0_13] : memref<8x1xf32, #tpu.memory_space<vmem>>, vector<8x1xf32>
    %cst_14 = arith.constant dense<0xFF800000> : vector<8xf32>
    %17 = vector.multi_reduction <maximumf>, %15, %cst_14 [1] : vector<8x8xf32> to vector<8xf32>
    %18 = vector.shape_cast %17 : vector<8xf32> to vector<8x1xf32>
    %19 = arith.maximumf %16, %18 : vector<8x1xf32>
    %20 = arith.subf %16, %19 : vector<8x1xf32>
    %21 = math.exp %20 : vector<8x1xf32>
    %22 = vector.broadcast %19 : vector<8x1xf32> to vector<8x8xf32>
    %23 = arith.subf %15, %22 : vector<8x8xf32>
    %24 = math.exp %23 : vector<8x8xf32>
    %c0_15 = arith.constant 0 : index
    %c0_16 = arith.constant 0 : index
    %25 = vector.load %arg10[%c0_15, %c0_16] : memref<8x1xf32, #tpu.memory_space<vmem>>, vector<8x1xf32>
    %26 = arith.mulf %21, %25 : vector<8x1xf32>
    %cst_17 = arith.constant dense<0.000000e+00> : vector<8xf32>
    %27 = vector.multi_reduction <add>, %24, %cst_17 [1] : vector<8x8xf32> to vector<8xf32>
    %28 = vector.shape_cast %27 : vector<8xf32> to vector<8x1xf32>
    %29 = arith.addf %26, %28 : vector<8x1xf32>
    %c0_18 = arith.constant 0 : index
    %c0_19 = arith.constant 0 : index
    %30 = vector.load %arg10[%c0_18, %c0_19] : memref<8x1xf32, #tpu.memory_space<vmem>>, vector<8x1xf32>
    tpu.vector_store %arg10[%c0_18, %c0_19], %29 {strides = array<i32>} : memref<8x1xf32, #tpu.memory_space<vmem>>, vector<8x1xf32>,
    %c0_20 = arith.constant 0 : index
    %c0_21 = arith.constant 0 : index
    %31 = vector.load %arg11[%c0_20, %c0_21] : memref<8x8xf32, #tpu.memory_space<vmem>>, vector<8x8xf32>
    %32 = vector.broadcast %21 : vector<8x1xf32> to vector<8x8xf32>
    %33 = arith.mulf %32, %31 : vector<8x8xf32>
    %34 = arith.truncf %24 : vector<8x8xf32> to vector<8x8xbf16>
    %c0_22 = arith.constant 0 : index
    %c0_23 = arith.constant 0 : index
    %c0_24 = arith.constant 0 : index
    %c0_25 = arith.constant 0 : index
    %35 = vector.load %arg6[%c0_22, %c0_23, %c0_24, %c0_25] : memref<1x1x8x8xf32, #tpu.memory_space<vmem>>, vector<1x1x8x8xf32>
    %36 = vector.shape_cast %35 : vector<1x1x8x8xf32> to vector<8x8xf32>
    %37 = arith.truncf %36 : vector<8x8xf32> to vector<8x8xbf16>
    %cst_26 = arith.constant dense<0.000000e+00> : vector<8x8xf32>
    %38 = tpu.matmul %34, %37, %cst_26 {dimension_numbers = #tpu.dot_dimension_numbers<[1], [0], [0], [1], [0, 0, 1, 1], [], []>} : vector<8x8xbf16>, vector<8x8xbf16>, vector<8x8xf32> -> vector<8x8xf32>
    %39 = arith.addf %33, %38 : vector<8x8xf32>
    %c0_27 = arith.constant 0 : index
    %c0_28 = arith.constant 0 : index
    %40 = vector.load %arg11[%c0_27, %c0_28] : memref<8x8xf32, #tpu.memory_space<vmem>>, vector<8x8xf32>
    tpu.vector_store %arg11[%c0_27, %c0_28], %39 {strides = array<i32>} : memref<8x8xf32, #tpu.memory_space<vmem>>, vector<8x8xf32>,
    %c0_29 = arith.constant 0 : index
    %c0_30 = arith.constant 0 : index
    %41 = vector.load %arg9[%c0_29, %c0_30] : memref<8x1xf32, #tpu.memory_space<vmem>>, vector<8x1xf32>
    tpu.vector_store %arg9[%c0_29, %c0_30], %19 {strides = array<i32>} : memref<8x1xf32, #tpu.memory_space<vmem>>, vector<8x1xf32>,
    %c0_i32_31 = arith.constant 0 : i32
    %42 = arith.cmpi eq, %arg3, %c0_i32_31 : i32
    %43 = arith.extui %42 : i1 to i32
    %c0_i32_32 = arith.constant 0 : i32
    %44 = arith.cmpi ne, %43, %c0_i32_32 : i32
    scf.if %44 {
      %c0_33 = arith.constant 0 : index
      %c0_34 = arith.constant 0 : index
      %45 = vector.load %arg11[%c0_33, %c0_34] : memref<8x8xf32, #tpu.memory_space<vmem>>, vector<8x8xf32>
      %c0_35 = arith.constant 0 : index
      %c0_36 = arith.constant 0 : index
      %46 = vector.load %arg10[%c0_35, %c0_36] : memref<8x1xf32, #tpu.memory_space<vmem>>, vector<8x1xf32>
      %47 = tpu.reciprocal %46 {approx = true} : vector<8x1xf32> -> vector<8x1xf32>
      %48 = vector.broadcast %47 : vector<8x1xf32> to vector<8x8xf32>
      %49 = arith.mulf %45, %48 : vector<8x8xf32>
      %c0_37 = arith.constant 0 : index
      %c0_38 = arith.constant 0 : index
      %c0_39 = arith.constant 0 : index
      %c0_40 = arith.constant 0 : index
      %50 = vector.load %arg8[%c0_37, %c0_38, %c0_39, %c0_40] : memref<1x1x8x8xf32, #tpu.memory_space<vmem>>, vector<1x1x8x8xf32>
      %51 = vector.shape_cast %50 : vector<1x1x8x8xf32> to vector<8x8xf32>
      %52 = vector.shape_cast %49 : vector<8x8xf32> to vector<1x1x8x8xf32>
      tpu.vector_store %arg8[%c0_37, %c0_38, %c0_39, %c0_40], %52 {strides = array<i32>} : memref<1x1x8x8xf32, #tpu.memory_space<vmem>>, vector<1x1x8x8xf32>,
    } else {
    }
    return
  }
  func.func @transform_0(%arg0: i32, %arg1: i32, %arg2: i32, %arg3: i32) -> (i32, i32, i32, i32) {
    %c0_i32 = arith.constant 0 : i32
    %c0_i32_0 = arith.constant 0 : i32
    return %arg0, %arg1, %arg2, %c0_i32 : i32, i32, i32, i32
  }
  func.func @transform_1(%arg0: i32, %arg1: i32, %arg2: i32, %arg3: i32) -> (i32, i32, i32, i32) {
    %c0_i32 = arith.constant 0 : i32
    %c0_i32_0 = arith.constant 0 : i32
    return %arg0, %arg1, %arg3, %c0_i32 : i32, i32, i32, i32
  }
  func.func @transform_2(%arg0: i32, %arg1: i32, %arg2: i32, %arg3: i32) -> (i32, i32, i32, i32) {
    %c0_i32 = arith.constant 0 : i32
    %c0_i32_0 = arith.constant 0 : i32
    return %arg0, %arg1, %arg3, %c0_i32 : i32, i32, i32, i32
  }
  func.func @transform_3(%arg0: i32, %arg1: i32, %arg2: i32, %arg3: i32) -> (i32, i32, i32) {
    %c0_i32 = arith.constant 0 : i32
    %c0_i32_0 = arith.constant 0 : i32
    return %arg0, %c0_i32, %arg3 : i32, i32, i32
  }
  func.func @transform_4(%arg0: i32, %arg1: i32, %arg2: i32, %arg3: i32) -> (i32, i32, i32, i32) {
    %c0_i32 = arith.constant 0 : i32
    %c0_i32_0 = arith.constant 0 : i32
    return %arg0, %arg1, %arg2, %c0_i32 : i32, i32, i32, i32
  }
}

module attributes {stable_mosaic.version = 11 : i64} {
  func.func @_linear_kernel(%arg0: i32, %arg1: i32, %arg2: i32, %arg3: memref<16x32xf32, #tpu.memory_space<vmem>>, %arg4: memref<32x60xbf16, #tpu.memory_space<vmem>>, %arg5: memref<1x60xf32, #tpu.memory_space<vmem>>, %arg6: memref<16x60xf32, #tpu.memory_space<vmem>>, %arg7: memref<16x60xf32, #tpu.memory_space<vmem>>) attributes {dimension_semantics = [#tpu.dimension_semantics<parallel>, #tpu.dimension_semantics<parallel>, #tpu.dimension_semantics<arbitrary>], iteration_bounds = array<i64: 1, 1, 1>, scalar_prefetch = 0 : i64, scratch_operands = 1 : i64, tpu.core_type = #tpu.core_type<tc>, window_params = [{transform_indices = @transform_0, window_bounds = array<i64: 16, 32>}, {transform_indices = @transform_1, window_bounds = array<i64: 32, 60>}, {transform_indices = @transform_2, window_bounds = array<i64: 1, 60>}, {transform_indices = @transform_3, window_bounds = array<i64: 16, 60>}]} {
    %c0_i32 = arith.constant 0 : i32
    %0 = arith.cmpi eq, %arg2, %c0_i32 : i32
    %1 = arith.extui %0 : i1 to i32
    %c0_i32_0 = arith.constant 0 : i32
    %2 = arith.cmpi ne, %1, %c0_i32_0 : i32
    scf.if %2 {
      %cst_10 = arith.constant 0.000000e+00 : f32
      %13 = vector.broadcast %cst_10 : f32 to vector<16x60xf32>
      %c0_11 = arith.constant 0 : index
      %c0_12 = arith.constant 0 : index
      %14 = vector.load %arg7[%c0_11, %c0_12] : memref<16x60xf32, #tpu.memory_space<vmem>>, vector<16x60xf32>
      tpu.vector_store %arg7[%c0_11, %c0_12], %13 {strides = array<i32>} : memref<16x60xf32, #tpu.memory_space<vmem>>, vector<16x60xf32>,
    } else {
    }
    %c0 = arith.constant 0 : index
    %c0_1 = arith.constant 0 : index
    %3 = vector.load %arg7[%c0, %c0_1] : memref<16x60xf32, #tpu.memory_space<vmem>>, vector<16x60xf32>
    %c0_2 = arith.constant 0 : index
    %c0_3 = arith.constant 0 : index
    %4 = vector.load %arg3[%c0_2, %c0_3] : memref<16x32xf32, #tpu.memory_space<vmem>>, vector<16x32xf32>
    %5 = arith.truncf %4 : vector<16x32xf32> to vector<16x32xbf16>
    %c0_4 = arith.constant 0 : index
    %c0_5 = arith.constant 0 : index
    %6 = vector.load %arg4[%c0_4, %c0_5] : memref<32x60xbf16, #tpu.memory_space<vmem>>, vector<32x60xbf16>
    %cst = arith.constant dense<0.000000e+00> : vector<16x60xf32>
    %7 = tpu.matmul %5, %6, %cst {dimension_numbers = #tpu.dot_dimension_numbers<[1], [0], [0], [1], [0, 0, 1, 1], [], []>} : vector<16x32xbf16>, vector<32x60xbf16>, vector<16x60xf32> -> vector<16x60xf32>
    %8 = arith.addf %3, %7 : vector<16x60xf32>
    %c0_6 = arith.constant 0 : index
    %c0_7 = arith.constant 0 : index
    %9 = vector.load %arg7[%c0_6, %c0_7] : memref<16x60xf32, #tpu.memory_space<vmem>>, vector<16x60xf32>
    tpu.vector_store %arg7[%c0_6, %c0_7], %8 {strides = array<i32>} : memref<16x60xf32, #tpu.memory_space<vmem>>, vector<16x60xf32>,
    %c0_i32_8 = arith.constant 0 : i32
    %10 = arith.cmpi eq, %arg2, %c0_i32_8 : i32
    %11 = arith.extui %10 : i1 to i32
    %c0_i32_9 = arith.constant 0 : i32
    %12 = arith.cmpi ne, %11, %c0_i32_9 : i32
    scf.if %12 {
      %c0_10 = arith.constant 0 : index
      %c0_11 = arith.constant 0 : index
      %13 = vector.load %arg7[%c0_10, %c0_11] : memref<16x60xf32, #tpu.memory_space<vmem>>, vector<16x60xf32>
      %c0_12 = arith.constant 0 : index
      %c0_13 = arith.constant 0 : index
      %14 = vector.load %arg5[%c0_12, %c0_13] : memref<1x60xf32, #tpu.memory_space<vmem>>, vector<1x60xf32>
      %15 = vector.broadcast %14 : vector<1x60xf32> to vector<16x60xf32>
      %16 = arith.addf %13, %15 : vector<16x60xf32>
      %c0_14 = arith.constant 0 : index
      %c0_15 = arith.constant 0 : index
      %17 = vector.load %arg6[%c0_14, %c0_15] : memref<16x60xf32, #tpu.memory_space<vmem>>, vector<16x60xf32>
      tpu.vector_store %arg6[%c0_14, %c0_15], %16 {strides = array<i32>} : memref<16x60xf32, #tpu.memory_space<vmem>>, vector<16x60xf32>,
    } else {
    }
    return
  }
  func.func @transform_0(%arg0: i32, %arg1: i32, %arg2: i32) -> (i32, i32) {
    %c0_i32 = arith.constant 0 : i32
    return %arg0, %arg2 : i32, i32
  }
  func.func @transform_1(%arg0: i32, %arg1: i32, %arg2: i32) -> (i32, i32) {
    %c0_i32 = arith.constant 0 : i32
    return %arg2, %arg1 : i32, i32
  }
  func.func @transform_2(%arg0: i32, %arg1: i32, %arg2: i32) -> (i32, i32) {
    %c0_i32 = arith.constant 0 : i32
    %c0_i32_0 = arith.constant 0 : i32
    return %c0_i32, %arg1 : i32, i32
  }
  func.func @transform_3(%arg0: i32, %arg1: i32, %arg2: i32) -> (i32, i32) {
    %c0_i32 = arith.constant 0 : i32
    return %arg0, %arg1 : i32, i32
  }
}

</mosaic_0001>

<bundles_post_ra>
// kernel: transformer_forward.46
= control target key start
LH: loop header
LB: loop body
LE: loop exit
PB: predicated region body
PF: predicated region fallthrough
CT: control target
= control target key end

     0   :  { %vm19_vm0 = vcmask 261120   ;;  %v95_v1 = vmov 0.0   ;;  %s144_s1 = inlined_call_operand.vmem [shape: bf16[32,32], index: 1, kind: input, shape index: {}]   ;;  %s145_s0 = inlined_call_operand.vmem [shape: f32[16,32], index: 0, kind: input, shape index: {}]   ;;  %s146_s2 = inlined_call_operand.vmem [shape: f32[1,32], index: 2, kind: input, shape index: {}]   ;;  %s147_s3 = inlined_call_operand.vmem [shape: f32[16,32], index: 3, kind: output, shape index: {}]  }
   0x1   :  { %v92_v0 = vld [vmem:[%s144_s1 + $0x8] sm:$0xff]  ;;  %20 = vst.msk [vmem:[#allocation2] sm:$0xff] %vm19_vm0, %v95_v1  ;;  %v91_v2 = vld [vmem:[%s144_s1] sm:$0xff] }
   0x2   :  { %21 = vst.msk [vmem:[#allocation2 + $0x8] sm:$0xff] %vm19_vm0, %v95_v1  ;;  %53 = vmatpush.bf16.msra.mxu0 %v92_v0  ;;  %v24_v3 = vld [vmem:[%s145_s0] sm:$0xff]  ;;  %v25_v4 = vld [vmem:[%s145_s0 + $0x8] sm:$0xff] }
   0x3   :  { %v26_v5 = vpack.c.bf16 %v25_v4, %v24_v3  ;;  %v94_v10 = vld [vmem:[%s146_s2] ss:$0 sm:$0xff] }
   0x6   :  { %54 = vmatpush.bf16.msra.mxu0 %v91_v2 }
   0x8   :  { %v22_v6 = vld [vmem:[#allocation2] sm:$0xff] }
   0x9   :  { %90 = vmatmul.msk.bf16.vlgmr.msra.gmra.mxu0 %vm19_vm0, %v26_v5  ;;  %v23_v9 = vld [vmem:[#allocation2 + $0x8] sm:$0xff] }
  0x86   :  { %v56_v7 = vpop.f32.mrf.mxu0 }
  0x87   :  { %v61_v8 = vadd.f32 %v56_v7, %v22_v6 }
  0x89   :  { %63 = vst.msk [vmem:[#allocation2] sm:$0xff] %vm19_vm0, %v61_v8 }
  0x8e   :  { %v58_v11 = vpop.f32.mrf.mxu0 }
  0x8f   :  { %v62_v12 = vadd.f32 %v58_v11, %v23_v9 }
  0x90   :  { %v68_v13 = vld [vmem:[#allocation2] sm:$0xff] }
  0x91   :  { %v74_v14 = vadd.f32 %v94_v10, %v68_v13  ;;  %64 = vst.msk [vmem:[#allocation2 + $0x8] sm:$0xff] %vm19_vm0, %v62_v12 }
  0x93   :  { %76 = vst.msk [vmem:[%s147_s3] sm:$0xff] %vm19_vm0, %v74_v14 }
  0x98   :  { %v69_v15 = vld [vmem:[#allocation2 + $0x8] sm:$0xff] }
  0x99   :  { %v75_v16 = vadd.f32 %v94_v10, %v69_v15 }
  0x9b   :  { %77 = vst.msk [vmem:[%s147_s3 + $0x8] sm:$0xff] %vm19_vm0, %v75_v16 }

// kernel: transformer_forward.44
= control target key start
LH: loop header
LB: loop body
LE: loop exit
PB: predicated region body
PF: predicated region fallthrough
CT: control target
= control target key end

     0   :  { %vm19_vm0 = vcmask 785408   ;;  %v96_v1 = vmov 0.0   ;;  %vm43_vm1 = vcmask 261120   ;;  %s144_s1 = inlined_call_operand.vmem [shape: bf16[32,96], index: 1, kind: input, shape index: {}]   ;;  %s145_s0 = inlined_call_operand.vmem [shape: f32[16,32], index: 0, kind: input, shape index: {}]   ;;  %s146_s2 = inlined_call_operand.vmem [shape: f32[1,96], index: 2, kind: input, shape index: {}]   ;;  %s147_s3 = inlined_call_operand.vmem [shape: f32[16,96], index: 3, kind: output, shape index: {}]  }
   0x1   :  { %v93_v0 = vld [vmem:[%s144_s1 + $0x8] sm:$0xff]  ;;  %20 = vst.msk [vmem:[#allocation2] sm:$0xff] %vm19_vm0, %v96_v1  ;;  %v92_v2 = vld [vmem:[%s144_s1] sm:$0xff] }
   0x2   :  { %21 = vst.msk [vmem:[#allocation2 + $0x8] sm:$0xff] %vm19_vm0, %v96_v1  ;;  %53 = vmatpush.bf16.msra.mxu0 %v93_v0  ;;  %v24_v3 = vld [vmem:[%s145_s0] sm:$0xff]  ;;  %v25_v4 = vld [vmem:[%s145_s0 + $0x8] sm:$0xff] }
   0x3   :  { %v26_v5 = vpack.c.bf16 %v25_v4, %v24_v3  ;;  %v95_v10 = vld [vmem:[%s146_s2] ss:$0 sm:$0xff] }
   0x6   :  { %54 = vmatpush.bf16.msra.mxu0 %v92_v2 }
   0x8   :  { %v22_v6 = vld [vmem:[#allocation2] sm:$0xff] }
   0x9   :  { %91 = vmatmul.msk.bf16.vlgmr.msra.gmra.mxu0 %vm43_vm1, %v26_v5  ;;  %v23_v9 = vld [vmem:[#allocation2 + $0x8] sm:$0xff] }
  0x86   :  { %v56_v7 = vpop.f32.mrf.mxu0 }
  0x87   :  { %v61_v8 = vadd.f32 %v56_v7, %v22_v6 }
  0x89   :  { %64 = vst.msk [vmem:[#allocation2] sm:$0xff] %vm19_vm0, %v61_v8 }
  0x8e   :  { %v58_v11 = vpop.f32.mrf.mxu0 }
  0x8f   :  { %v62_v12 = vadd.f32 %v58_v11, %v23_v9 }
  0x90   :  { %v69_v13 = vld [vmem:[#allocation2] sm:$0xff] }
  0x91   :  { %v75_v14 = vadd.f32 %v95_v10, %v69_v13  ;;  %65 = vst.msk [vmem:[#allocation2 + $0x8] sm:$0xff] %vm19_vm0, %v62_v12 }
  0x93   :  { %77 = vst.msk [vmem:[%s147_s3] sm:$0xff] %vm19_vm0, %v75_v14 }
  0x98   :  { %v70_v15 = vld [vmem:[#allocation2 + $0x8] sm:$0xff] }
  0x99   :  { %v76_v16 = vadd.f32 %v95_v10, %v70_v15 }
  0x9b   :  { %78 = vst.msk [vmem:[%s147_s3 + $0x8] sm:$0xff] %vm19_vm0, %v76_v16 }

// kernel: transformer_forward.45
= control target key start
LH: loop header
LB: loop body
LE: loop exit
PB: predicated region body
PF: predicated region fallthrough
CT: control target
= control target key end

     0   :  { %s860_s18 = smov 0   ;;  %s862_s19 = smov 0   ;;  %s941_s0 = inlined_call_operand.vmem [shape: f32[2,4,8,8], index: 0, kind: input, shape index: {}]   ;;  %s942_s1 = inlined_call_operand.vmem [shape: f32[2,4,8,8], index: 1, kind: input, shape index: {}]   ;;  %s943_s2 = inlined_call_operand.vmem [shape: f32[2,4,8,8], index: 2, kind: input, shape index: {}]   ;;  %s944_s3 = inlined_call_operand.vmem [shape: f32[8,8], index: 3, kind: input, shape index: {}]   ;;  %s945_s4 = inlined_call_operand.vmem [shape: f32[2,1,8], index: 4, kind: input, shape index: {}]   ;;  %s946_s5 = inlined_call_operand.vmem [shape: f32[2,4,8,8], index: 5, kind: output, shape index: {}]  }
   0x1   :  { %s864_s20 = smov 0   ;;  %s866_s21 = smov 0  }
   0x2   :  { %s868_s22 = smov 0  }
   0x3 LB: > { %s37_s23 = sadd.s32 1, %s817_s20  ;;  %s41_s24 = sadd.s32 1, %s821_s21  ;;  %s825_s22 = sphi %s868_s22, %s15_s22   ;;  %s821_s21 = sphi %s866_s21, %s950_s21   ;;  %s817_s20 = sphi %s864_s20, %s949_s20   ;;  %s813_s19 = sphi %s862_s19, %s948_s19   ;;  %s809_s18 = sphi %s860_s18, %s947_s18  }
   0x4   : > { %p39_p0 = scmp.ge.s32.totalorder %s37_s23, 4  ;;  %p721_p1 = scmp.ge.s32.totalorder %s825_s22, 1 }
   0x5   : > { %p294_p2 = scmp.lt.s32.totalorder %s825_s22, 9 }
   0x6   : > { %s952_s23 = smov (%p39_p0, %s37_s23), 0  ;;  %s954_s24 = smov (!%p39_p0, %s41_s24), %s821_s21 }
   0x7   : > { %p295_p3 = pnand %p721_p1, %p294_p2  ;;  %p43_p4 = scmp.ge.s32.totalorder %s954_s24, 2 }
   0x8   : > { %p369_p5 = scmp.lt.s32.totalorder (!%p295_p3), %s813_s19, 1  ;;  %p371_p6 = scmp.lt.s32.totalorder (!%p295_p3), %s809_s18, 3 }
   0x9   : > { %s956_s24 = smov (%p43_p4, %s954_s24), 0  ;;  %298 = sbr.rel (%p295_p3) target bundleno = 635 (0x27b), region = 40 }
   0xe   : > { %s958_s19 = smov (!%p369_p5, %s813_s19), 1  ;;  %s960_s18 = smov (!%p371_p6, %s809_s18), 3  ;;  %vm434_vm0 = vcmask 64512   ;;  %vm431_vm1 = vcmask 7168   ;;  %v827_v5 = vmov -inf   ;;  %v461_v7 = vld [vmem:[%s944_s3] sm:$0xff] }
   0xf   : > { %s722_s25 = sshll.u32 %s958_s19, 2  ;;  %s414_s11 = scalar_lea.vmem %s945_s4, %s958_s19  ;;  %432 = vst.msk [vmem:[#allocation2] sm:$0xff] %vm431_vm1, %v827_v5  ;;  %v828_v14 = vmov 0   ;;  %v829_v15 = vmov 0.0   ;;  %vm505_vm2 = vcmask 1043456  }
  0x10   : > { %s377_s26 = sadd.s32 %s722_s25, %s960_s18  ;;  %v780_v9 = vld [vmem:[%s414_s11] ss:$0 sm:$0xff]  ;;  %777 = vset.pattern.permute.xlu0 %v828_v14  ;;  %778 = vset.pattern.permute.xlu1 %v828_v14  ;;  %433 = vst.msk [vmem:[#allocation3] sm:$0xff] %vm431_vm1, %v829_v15 }
  0x11   : > { %s890_s27 = sshll.u32 %s377_s26, 3  ;;  %779 = vset.pattern.permute.xlu2 %v828_v14  ;;  %435 = vst.msk [vmem:[#allocation4] sm:$0xff] %vm434_vm0, %v829_v15 }
  0x12   : > { %s390_s30 = scalar_lea.vmem %s942_s1, %s890_s27  ;;  %s379_s8 = scalar_lea.vmem %s941_s0, %s890_s27 }
  0x13   : > { %v438_v0 = vld [vmem:[%s390_s30] sm:$0xff]  ;;  %s401_s16 = scalar_lea.vmem %s943_s2, %s890_s27  ;;  %s425_s19 = scalar_lea.vmem %s946_s5, %s890_s27 }
  0x14   : > { %v439_v1 = vpack.c.bf16 %v438_v0, %v438_v0  ;;  %v436_v3 = vld [vmem:[%s379_s8] sm:$0xff] }
  0x15   : > { %v437_v4 = vpack.c.bf16 %v436_v3, %v436_v3  ;;  %v500_v20 = vld [vmem:[%s401_s16] sm:$0xff] }
  0x16   : > { %v445_v2 = vsel %vm434_vm0, %v439_v1, 0  ;;  %v468_v16 = vld [vmem:[#allocation2] sm:$0xff]  ;;  %v501_v21 = vpack.c.bf16 %v500_v20, %v500_v20 }
  0x17   : > { %454 = vmatpush.bf16.xpose.msra.mxu0 %v445_v2  ;;  %v484_v31 = vld [vmem:[#allocation3] sm:$0xff] }
  0x18   : > { %v507_v22 = vsel %vm505_vm2, %v501_v21, 0  ;;  %v492_v39 = vld [vmem:[#allocation4] sm:$0xff] }
  0x19   : > { %516 = vmatpush.bf16.msra.mxu1 %v507_v22 }
  0x1e   : > { %730 = vmatmul.msk.bf16.vlgmr.msra.gmra.mxu0 %vm434_vm0, %v437_v4 }
  0x9b   : > { %v456_v6 = vpop.f32.mrf.mxu0 }
  0x9c   : > { %v460_v8 = vmul.f32 0.35355338, %v456_v6 }
  0x9e   : > { %v462_v10 = vadd.f32 %v461_v7, %v460_v8 }
  0xa0   : > { %v467_v11 = vadd.f32 %v780_v9, %v462_v10 }
  0xa2   : > { %v469_v12 = vsel %vm434_vm0, %v467_v11, -inf }
  0xa3   : > { %470 = vmax.xlane.f32.xlu0 %v469_v12  ;;  %v458_v13 = vpop.f32.mrf.mxu0 }
 0x116   : > { %v471_v17 = vpop.xlane.xlu0 %470 }
 0x117   : > { %v472_v18 = vmax.f32 %v468_v16, %v471_v17 }
 0x119   : > { %v473_v19 = vsub.f32 %v468_v16, %v472_v18  ;;  %524 = vst.msk [vmem:[#allocation2] sm:$0xff] %vm431_vm1, %v472_v18  ;;  %478 = vperm.xlu0 %777, %v472_v18  }
 0x11b   : > { %v474_v29 = vmul.f32 1.442695, %v473_v19 }
 0x18b   : > { %v479_v23 = vpop.permute.xlu0 %478 }
 0x18c   : > { %v481_v24 = vsub.f32 %v467_v11, %v479_v23 }
 0x18e   : > { %v482_v25 = vmul.f32 1.442695, %v481_v24 }
 0x190   : > { %781 = vpow2.f32 %v482_v25 }
 0x191   : > { %783 = vpow2.f32 %v474_v29 }
 0x196   : > { %v782_v26 = vpop.eup %781 }
 0x197   : > { %v486_v27 = vsel %vm434_vm0, %v782_v26, 0.0  ;;  %v499_v28 = vpack.c.bf16 %v782_v26, %v782_v26  ;;  %v784_v30 = vpop.eup %783 }
 0x198   : > { %487 = vadd.xlane.f32.xlu1 %v486_v27  ;;  %v485_v32 = vmul.f32 %v784_v30, %v484_v31 }
 0x199   : > { %731 = vmatmul.msk.bf16.vlgmr.msra.gmra.mxu1 %vm434_vm0, %v499_v28 }
 0x1b1   : > { %495 = vperm.xlu1 %778, %v784_v30  }
 0x20b   : > { %v488_v33 = vpop.xlane.xlu1 %487 }
 0x20c   : > { %v489_v34 = vadd.f32 %v488_v33, %v485_v32 }
 0x20e   : > { %491 = vst.msk [vmem:[#allocation3] sm:$0xff] %vm431_vm1, %v489_v34 }
 0x215   : > { %v529_v35 = vld [vmem:[#allocation3] sm:$0xff] }
 0x216   : > { %v518_v36 = vpop.f32.mrf.mxu1  ;;  %785 = vrcp.f32 %v529_v35 }
 0x21c   : > { %v786_v37 = vpop.eup %785 }
 0x21d   : > { %533 = vperm.xlu2 %779, %v786_v37  }
 0x21e   : > { %v520_v38 = vpop.f32.mrf.mxu1 }
 0x223   : > { %v496_v40 = vpop.permute.xlu1 %495 }
 0x224   : > { %v498_v41 = vmul.f32 %v496_v40, %v492_v39 }
 0x226   : > { %v522_v42 = vadd.f32 %v518_v36, %v498_v41 }
 0x228   : > { %523 = vst.msk [vmem:[#allocation4] sm:$0xff] %vm434_vm0, %v522_v42 }
 0x22f   : > { %v528_v43 = vld [vmem:[#allocation4] sm:$0xff] }
 0x277   : > { %v534_v44 = vpop.permute.xlu2 %533 }
 0x278   : > { %v536_v45 = vmul.f32 %v534_v44, %v528_v43 }
 0x27a   : > { %537 = vst.msk [vmem:[%s425_s19] sm:$0xff] %vm434_vm0, %v536_v45 }
 0x27b PF: > { %s15_s22 = sadd.s32 1, %s825_s22   ;;  %s947_s18 = smov %s817_s20 }
 0x27c   : > { %p12_p7 = scmp.ge.s32.totalorder %s15_s22, 10   ;;  %s948_s19 = smov %s821_s21 }
 0x27d   : > { %s949_s20 = smov %s952_s23  ;;  %s950_s21 = smov %s956_s24 }
 0x27e   :  { %14 = sbr.rel (!%p12_p7) target bundleno = 3 (0x3), region = 90 }

// kernel: transformer_forward.47
= control target key start
LH: loop header
LB: loop body
LE: loop exit
PB: predicated region body
PF: predicated region fallthrough
CT: control target
= control target key end

     0   :  { %vm23_vm0 = vcmask 261120   ;;  %v102_v8 = vmov 32.0   ;;  %s158_s0 = inlined_call_operand.vmem [shape: f32[16,32], index: 0, kind: input, shape index: {}]   ;;  %s159_s1 = inlined_call_operand.vmem [shape: f32[16,32], index: 1, kind: input, shape index: {}]   ;;  %s160_s2 = inlined_call_operand.vmem [shape: f32[1,32], index: 2, kind: input, shape index: {}]   ;;  %s161_s3 = inlined_call_operand.vmem [shape: f32[1,32], index: 3, kind: input, shape index: {}]   ;;  %s162_s4 = inlined_call_operand.vmem [shape: f32[16,32], index: 4, kind: output, shape index: {}]  }
   0x1   :  { %v17_v0 = vld [vmem:[%s158_s0] sm:$0xff]  ;;  %v18_v3 = vld [vmem:[%s158_s0 + $0x8] sm:$0xff]  ;;  %96 = vrcp.f32 %v102_v8 }
   0x2   :  { %v19_v1 = vld [vmem:[%s159_s1] sm:$0xff]  ;;  %v20_v4 = vld [vmem:[%s159_s1 + $0x8] sm:$0xff] }
   0x3   :  { %v21_v2 = vadd.f32 %v19_v1, %v17_v0  ;;  %v22_v6 = vadd.f32 %v20_v4, %v18_v3  ;;  %v94_v39 = vld [vmem:[%s160_s2] ss:$0 sm:$0xff] }
   0x4   :  { %v95_v42 = vld [vmem:[%s161_s3] ss:$0 sm:$0xff] }
   0x5   :  { %v24_v5 = vsel %vm23_vm0, %v21_v2, 0.0  ;;  %v27_v7 = vsel %vm23_vm0, %v22_v6, 0.0 }
   0x6   :  { %25 = vadd.xlane.f32.xlu0 %v24_v5 }
   0x7   :  { %v97_v9 = vpop.eup %96 }
   0x8   :  { %v31_v10 = vmul.f32 32.0, %v97_v9  ;;  %vm35_vm1 = vweird.f32 %v97_v9 }
   0xa   :  { %v32_v11 = vsub.f32 1.0, %v31_v10 }
   0xc   :  { %v33_v12 = vmul.f32 %v97_v9, %v32_v11 }
   0xe   :  { %28 = vadd.xlane.f32.xlu0 %v27_v7  ;;  %v34_v13 = vadd.f32 %v97_v9, %v33_v12 }
  0x10   :  { %v36_v14 = vsel %vm35_vm1, %v97_v9, %v34_v13 }
  0x79   :  { %v26_v15 = vpop.xlane.xlu0 %25 }
  0x7a   :  { %v37_v16 = vmul.f32 %v36_v14, %v26_v15 }
  0x7c   :  { %v39_v17 = vsub.f32 %v21_v2, %v37_v16 }
  0x7e   :  { %v41_v18 = vmul.f32 %v39_v17, %v39_v17 }
  0x80   :  { %v43_v19 = vsel %vm23_vm0, %v41_v18, 0.0 }
  0x81   :  { %44 = vadd.xlane.f32.xlu1 %v43_v19  ;;  %v29_v20 = vpop.xlane.xlu0 %28 }
  0x82   :  { %v38_v21 = vmul.f32 %v36_v14, %v29_v20 }
  0x84   :  { %v40_v22 = vsub.f32 %v22_v6, %v38_v21 }
  0x86   :  { %v42_v23 = vmul.f32 %v40_v22, %v40_v22 }
  0x88   :  { %v46_v24 = vsel %vm23_vm0, %v42_v23, 0.0 }
  0x89   :  { %47 = vadd.xlane.f32.xlu1 %v46_v24 }
  0xf4   :  { %v45_v25 = vpop.xlane.xlu1 %44 }
  0xf5   :  { %v49_v26 = vmul.f32 %v45_v25, %v36_v14 }
  0xf7   :  { %v51_v27 = vadd.f32 1e-05, %v49_v26 }
  0xf9   :  { %98 = vrsqrt.f32 %v51_v27  ;;  %vm59_vm3 = vweird.f32 %v51_v27 }
  0xfc   :  { %v48_v28 = vpop.xlane.xlu1 %47 }
  0xfd   :  { %v50_v29 = vmul.f32 %v48_v28, %v36_v14 }
  0xff   :  { %v99_v30 = vpop.eup %98  ;;  %v52_v31 = vadd.f32 1e-05, %v50_v29 }
 0x100   :  { %v54_v32 = vmul.f32 %v99_v30, %v51_v27  ;;  %vm60_vm2 = vweird.f32 %v99_v30 }
 0x101   :  { %100 = vrsqrt.f32 %v52_v31  ;;  %vm61_vm4 = vmor %vm59_vm3, %vm60_vm2  ;;  %vm69_vm6 = vweird.f32 %v52_v31 }
 0x102   :  { %v55_v33 = vmul.f32 %v99_v30, %v54_v32 }
 0x104   :  { %v56_v34 = vmul.f32 0.5, %v55_v33 }
 0x106   :  { %v57_v35 = vsub.f32 1.5, %v56_v34 }
 0x107   :  { %v101_v36 = vpop.eup %100 }
 0x108   :  { %v58_v37 = vmul.f32 %v99_v30, %v57_v35  ;;  %v64_v38 = vmul.f32 %v101_v36, %v52_v31  ;;  %vm70_vm5 = vweird.f32 %v101_v36 }
 0x109   :  { %vm71_vm7 = vmor %vm69_vm6, %vm70_vm5 }
 0x10a   :  { %v62_v40 = vsel %vm61_vm4, %v99_v30, %v58_v37  ;;  %v65_v41 = vmul.f32 %v101_v36, %v64_v38 }
 0x10b   :  { %v73_v43 = vmul.f32 %v62_v40, %v39_v17 }
 0x10c   :  { %v66_v44 = vmul.f32 0.5, %v65_v41 }
 0x10d   :  { %v79_v45 = vmul.f32 %v94_v39, %v73_v43 }
 0x10e   :  { %v67_v46 = vsub.f32 1.5, %v66_v44 }
 0x10f   :  { %v85_v47 = vadd.f32 %v95_v42, %v79_v45 }
 0x110   :  { %v68_v48 = vmul.f32 %v101_v36, %v67_v46 }
 0x111   :  { %87 = vst.msk [vmem:[%s162_s4] sm:$0xff] %vm23_vm0, %v85_v47 }
 0x112   :  { %v72_v49 = vsel %vm71_vm7, %v101_v36, %v68_v48 }
 0x113   :  { %v74_v50 = vmul.f32 %v72_v49, %v40_v22 }
 0x115   :  { %v80_v51 = vmul.f32 %v94_v39, %v74_v50 }
 0x117   :  { %v86_v52 = vadd.f32 %v95_v42, %v80_v51 }
 0x119   :  { %88 = vst.msk [vmem:[%s162_s4 + $0x8] sm:$0xff] %vm23_vm0, %v86_v52 }

// kernel: transformer_forward.43
= control target key start
LH: loop header
LB: loop body
LE: loop exit
PB: predicated region body
PF: predicated region fallthrough
CT: control target
= control target key end

     0   :  { %vm16_vm0 = vcmask 261120   ;;  %v95_v4 = vmov 32.0   ;;  %s140_s0 = inlined_call_operand.vmem [shape: f32[16,32], index: 0, kind: input, shape index: {}]   ;;  %s141_s1 = inlined_call_operand.vmem [shape: f32[1,32], index: 1, kind: input, shape index: {}]   ;;  %s142_s2 = inlined_call_operand.vmem [shape: f32[1,32], index: 2, kind: input, shape index: {}]   ;;  %s143_s3 = inlined_call_operand.vmem [shape: f32[16,32], index: 3, kind: output, shape index: {}]  }
   0x1   :  { %v14_v0 = vld [vmem:[%s140_s0] sm:$0xff]  ;;  %v15_v2 = vld [vmem:[%s140_s0 + $0x8] sm:$0xff]  ;;  %89 = vrcp.f32 %v95_v4 }
   0x2   :  { %v17_v1 = vsel %vm16_vm0, %v14_v0, 0.0  ;;  %v20_v3 = vsel %vm16_vm0, %v15_v2, 0.0  ;;  %v87_v35 = vld [vmem:[%s141_s1] ss:$0 sm:$0xff] }
   0x3   :  { %18 = vadd.xlane.f32.xlu0 %v17_v1  ;;  %v88_v38 = vld [vmem:[%s142_s2] ss:$0 sm:$0xff] }
   0x7   :  { %v90_v5 = vpop.eup %89 }
   0x8   :  { %v24_v6 = vmul.f32 32.0, %v90_v5  ;;  %vm28_vm1 = vweird.f32 %v90_v5 }
   0xa   :  { %v25_v7 = vsub.f32 1.0, %v24_v6 }
   0xb   :  { %21 = vadd.xlane.f32.xlu0 %v20_v3 }
   0xc   :  { %v26_v8 = vmul.f32 %v90_v5, %v25_v7 }
   0xe   :  { %v27_v9 = vadd.f32 %v90_v5, %v26_v8 }
  0x10   :  { %v29_v10 = vsel %vm28_vm1, %v90_v5, %v27_v9 }
  0x76   :  { %v19_v11 = vpop.xlane.xlu0 %18 }
  0x77   :  { %v30_v12 = vmul.f32 %v29_v10, %v19_v11 }
  0x79   :  { %v32_v13 = vsub.f32 %v14_v0, %v30_v12 }
  0x7b   :  { %v34_v14 = vmul.f32 %v32_v13, %v32_v13 }
  0x7d   :  { %v36_v15 = vsel %vm16_vm0, %v34_v14, 0.0 }
  0x7e   :  { %37 = vadd.xlane.f32.xlu1 %v36_v15  ;;  %v22_v16 = vpop.xlane.xlu0 %21 }
  0x7f   :  { %v31_v17 = vmul.f32 %v29_v10, %v22_v16 }
  0x81   :  { %v33_v18 = vsub.f32 %v15_v2, %v31_v17 }
  0x83   :  { %v35_v19 = vmul.f32 %v33_v18, %v33_v18 }
  0x85   :  { %v39_v20 = vsel %vm16_vm0, %v35_v19, 0.0 }
  0x86   :  { %40 = vadd.xlane.f32.xlu1 %v39_v20 }
  0xf1   :  { %v38_v21 = vpop.xlane.xlu1 %37 }
  0xf2   :  { %v42_v22 = vmul.f32 %v38_v21, %v29_v10 }
  0xf4   :  { %v44_v23 = vadd.f32 1e-05, %v42_v22 }
  0xf6   :  { %91 = vrsqrt.f32 %v44_v23  ;;  %vm52_vm3 = vweird.f32 %v44_v23 }
  0xf9   :  { %v41_v24 = vpop.xlane.xlu1 %40 }
  0xfa   :  { %v43_v25 = vmul.f32 %v41_v24, %v29_v10 }
  0xfc   :  { %v92_v26 = vpop.eup %91  ;;  %v45_v27 = vadd.f32 1e-05, %v43_v25 }
  0xfd   :  { %v47_v28 = vmul.f32 %v92_v26, %v44_v23  ;;  %vm53_vm2 = vweird.f32 %v92_v26 }
  0xfe   :  { %93 = vrsqrt.f32 %v45_v27  ;;  %vm54_vm4 = vmor %vm52_vm3, %vm53_vm2  ;;  %vm62_vm6 = vweird.f32 %v45_v27 }
  0xff   :  { %v48_v29 = vmul.f32 %v92_v26, %v47_v28 }
 0x101   :  { %v49_v30 = vmul.f32 0.5, %v48_v29 }
 0x103   :  { %v50_v31 = vsub.f32 1.5, %v49_v30 }
 0x104   :  { %v94_v32 = vpop.eup %93 }
 0x105   :  { %v51_v33 = vmul.f32 %v92_v26, %v50_v31  ;;  %v57_v34 = vmul.f32 %v94_v32, %v45_v27  ;;  %vm63_vm5 = vweird.f32 %v94_v32 }
 0x106   :  { %vm64_vm7 = vmor %vm62_vm6, %vm63_vm5 }
 0x107   :  { %v55_v36 = vsel %vm54_vm4, %v92_v26, %v51_v33  ;;  %v58_v37 = vmul.f32 %v94_v32, %v57_v34 }
 0x108   :  { %v66_v39 = vmul.f32 %v55_v36, %v32_v13 }
 0x109   :  { %v59_v40 = vmul.f32 0.5, %v58_v37 }
 0x10a   :  { %v72_v41 = vmul.f32 %v87_v35, %v66_v39 }
 0x10b   :  { %v60_v42 = vsub.f32 1.5, %v59_v40 }
 0x10c   :  { %v78_v43 = vadd.f32 %v88_v38, %v72_v41 }
 0x10d   :  { %v61_v44 = vmul.f32 %v94_v32, %v60_v42 }
 0x10e   :  { %80 = vst.msk [vmem:[%s143_s3] sm:$0xff] %vm16_vm0, %v78_v43 }
 0x10f   :  { %v65_v45 = vsel %vm64_vm7, %v94_v32, %v61_v44 }
 0x110   :  { %v67_v46 = vmul.f32 %v65_v45, %v33_v18 }
 0x112   :  { %v73_v47 = vmul.f32 %v87_v35, %v67_v46 }
 0x114   :  { %v79_v48 = vadd.f32 %v88_v38, %v73_v47 }
 0x116   :  { %81 = vst.msk [vmem:[%s143_s3 + $0x8] sm:$0xff] %vm16_vm0, %v79_v48 }

// kernel: transformer_forward.49
= control target key start
LH: loop header
LB: loop body
LE: loop exit
PB: predicated region body
PF: predicated region fallthrough
CT: control target
= control target key end

     0   :  { %vm19_vm0 = vcmask 523264   ;;  %v96_v1 = vmov 0.0   ;;  %vm43_vm1 = vcmask 261120   ;;  %s144_s1 = inlined_call_operand.vmem [shape: bf16[32,64], index: 1, kind: input, shape index: {}]   ;;  %s145_s0 = inlined_call_operand.vmem [shape: f32[16,32], index: 0, kind: input, shape index: {}]   ;;  %s146_s2 = inlined_call_operand.vmem [shape: f32[1,64], index: 2, kind: input, shape index: {}]   ;;  %s147_s3 = inlined_call_operand.vmem [shape: f32[16,64], index: 3, kind: output, shape index: {}]  }
   0x1   :  { %v93_v0 = vld [vmem:[%s144_s1 + $0x8] sm:$0xff]  ;;  %20 = vst.msk [vmem:[#allocation2] sm:$0xff] %vm19_vm0, %v96_v1  ;;  %v92_v2 = vld [vmem:[%s144_s1] sm:$0xff] }
   0x2   :  { %21 = vst.msk [vmem:[#allocation2 + $0x8] sm:$0xff] %vm19_vm0, %v96_v1  ;;  %53 = vmatpush.bf16.msra.mxu0 %v93_v0  ;;  %v24_v3 = vld [vmem:[%s145_s0] sm:$0xff]  ;;  %v25_v4 = vld [vmem:[%s145_s0 + $0x8] sm:$0xff] }
   0x3   :  { %v26_v5 = vpack.c.bf16 %v25_v4, %v24_v3  ;;  %v95_v10 = vld [vmem:[%s146_s2] ss:$0 sm:$0xff] }
   0x6   :  { %54 = vmatpush.bf16.msra.mxu0 %v92_v2 }
   0x8   :  { %v22_v6 = vld [vmem:[#allocation2] sm:$0xff] }
   0x9   :  { %91 = vmatmul.msk.bf16.vlgmr.msra.gmra.mxu0 %vm43_vm1, %v26_v5  ;;  %v23_v9 = vld [vmem:[#allocation2 + $0x8] sm:$0xff] }
  0x86   :  { %v56_v7 = vpop.f32.mrf.mxu0 }
  0x87   :  { %v61_v8 = vadd.f32 %v56_v7, %v22_v6 }
  0x89   :  { %64 = vst.msk [vmem:[#allocation2] sm:$0xff] %vm19_vm0, %v61_v8 }
  0x8e   :  { %v58_v11 = vpop.f32.mrf.mxu0 }
  0x8f   :  { %v62_v12 = vadd.f32 %v58_v11, %v23_v9 }
  0x90   :  { %v69_v13 = vld [vmem:[#allocation2] sm:$0xff] }
  0x91   :  { %v75_v14 = vadd.f32 %v95_v10, %v69_v13  ;;  %65 = vst.msk [vmem:[#allocation2 + $0x8] sm:$0xff] %vm19_vm0, %v62_v12 }
  0x93   :  { %77 = vst.msk [vmem:[%s147_s3] sm:$0xff] %vm19_vm0, %v75_v14 }
  0x98   :  { %v70_v15 = vld [vmem:[#allocation2 + $0x8] sm:$0xff] }
  0x99   :  { %v76_v16 = vadd.f32 %v95_v10, %v70_v15 }
  0x9b   :  { %78 = vst.msk [vmem:[%s147_s3 + $0x8] sm:$0xff] %vm19_vm0, %v76_v16 }

// kernel: transformer_forward.37
= control target key start
LH: loop header
LB: loop body
LE: loop exit
PB: predicated region body
PF: predicated region fallthrough
CT: control target
= control target key end

     0   :  { %vm31_vm0 = vcmask 261120   ;;  %v262_v9 = vmov 0.0   ;;  %vm112_vm1 = vcmask 523264   ;;  %v263_v33 = vmov 32.0   ;;  %s357_s1 = inlined_call_operand.vmem [shape: bf16[32,64], index: 1, kind: input, shape index: {}]   ;;  %s358_s0 = inlined_call_operand.vmem [shape: f32[16,32], index: 0, kind: input, shape index: {}]   ;;  %s359_s2 = inlined_call_operand.vmem [shape: f32[1,64], index: 2, kind: input, shape index: {}]   ;;  %s360_s3 = inlined_call_operand.vmem [shape: bf16[64,32], index: 3, kind: input, shape index: {}]   ;;  %s361_s4 = inlined_call_operand.vmem [shape: f32[1,32], index: 4, kind: input, shape index: {}]   ;;  %s362_s5 = inlined_call_operand.vmem [shape: f32[1,32], index: 5, kind: input, shape index: {}]   ;;  %s363_s6 = inlined_call_operand.vmem [shape: f32[1,32], index: 6, kind: input, shape index: {}]   ;;  %s364_s7 = inlined_call_operand.vmem [shape: f32[16,32], index: 7, kind: output, shape index: {}]  }
   0x1   :  { %v245_v0 = vld [vmem:[%s357_s1 + $0x8] sm:$0xff]  ;;  %v244_v1 = vld [vmem:[%s357_s1] sm:$0xff]  ;;  %v249_v5 = vld [vmem:[%s360_s3 + $0x18] sm:$0xff]  ;;  %32 = vst.msk [vmem:[#allocation2] sm:$0xff] %vm31_vm0, %v262_v9  ;;  %256 = vrcp.f32 %v263_v33 }
   0x2   :  { %67 = vmatpush.bf16.msra.mxu0 %v245_v0  ;;  %v34_v2 = vld [vmem:[%s358_s0] sm:$0xff]  ;;  %v35_v3 = vld [vmem:[%s358_s0 + $0x8] sm:$0xff]  ;;  %120 = vmatpush.bf16.msra.mxu1 %v249_v5  ;;  %v248_v6 = vld [vmem:[%s360_s3 + $0x10] sm:$0xff]  ;;  %33 = vst.msk [vmem:[#allocation2 + $0x8] sm:$0xff] %vm31_vm0, %v262_v9 }
   0x3   :  { %v36_v4 = vpack.c.bf16 %v35_v3, %v34_v2  ;;  %v247_v7 = vld [vmem:[%s360_s3 + $0x8] sm:$0xff]  ;;  %v246_v8 = vld [vmem:[%s360_s3] sm:$0xff] }
   0x4   :  { %v252_v11 = vld [vmem:[%s359_s2] ss:$0 sm:$0xff] }
   0x5   :  { %v253_v22 = vld [vmem:[%s361_s4] ss:$0 sm:$0xff] }
   0x6   :  { %68 = vmatpush.bf16.msra.mxu0 %v244_v1  ;;  %121 = vmatpush.bf16.msra.mxu1 %v248_v6  ;;  %v254_v0 = vld [vmem:[%s362_s5] ss:$0 sm:$0xff] }
   0x7   :  { %v257_v34 = vpop.eup %256 }
   0x8   :  { %v77_v18 = vld [vmem:[#allocation2] sm:$0xff]  ;;  %v156_v35 = vmul.f32 32.0, %v257_v34  ;;  %vm160_vm2 = vweird.f32 %v257_v34 }
   0x9   :  { %226 = vmatmul.msk.bf16.vlgmr.msra.gmra.mxu0 %vm31_vm0, %v36_v4  ;;  %v78_v21 = vld [vmem:[#allocation2 + $0x8] sm:$0xff] }
   0xa   :  { %122 = vmatpush.bf16.msra.mxu1 %v247_v7  ;;  %v157_v36 = vsub.f32 1.0, %v156_v35 }
   0xc   :  { %v158_v37 = vmul.f32 %v257_v34, %v157_v36 }
   0xe   :  { %123 = vmatpush.bf16.msra.mxu1 %v246_v8  ;;  %v159_v38 = vadd.f32 %v257_v34, %v158_v37 }
  0x10   :  { %v161_v39 = vsel %vm160_vm2, %v257_v34, %v159_v38 }
  0x86   :  { %v70_v10 = vpop.f32.mrf.mxu0 }
  0x87   :  { %v71_v12 = vadd.f32 %v252_v11, %v70_v10 }
  0x89   :  { %v75_v15 = vmax.f32 %v71_v12, 0.0 }
  0x8e   :  { %v72_v13 = vpop.f32.mrf.mxu0 }
  0x8f   :  { %v73_v14 = vadd.f32 %v252_v11, %v72_v13 }
  0x91   :  { %v76_v16 = vmax.f32 %v73_v14, 0.0 }
  0x93   :  { %v79_v17 = vpack.c.bf16 %v76_v16, %v75_v15 }
  0x95   :  { %243 = vmatmul.msk.bf16.vlgmr.msra.gmra.mxu1 %vm112_vm1, %v79_v17 }
 0x112   :  { %v125_v19 = vpop.f32.mrf.mxu1 }
 0x113   :  { %v130_v20 = vadd.f32 %v125_v19, %v77_v18 }
 0x115   :  { %132 = vst.msk [vmem:[#allocation2] sm:$0xff] %vm31_vm0, %v130_v20 }
 0x11a   :  { %v127_v23 = vpop.f32.mrf.mxu1 }
 0x11b   :  { %v131_v24 = vadd.f32 %v127_v23, %v78_v21 }
 0x11c   :  { %v137_v25 = vld [vmem:[#allocation2] sm:$0xff] }
 0x11d   :  { %133 = vst.msk [vmem:[#allocation2 + $0x8] sm:$0xff] %vm31_vm0, %v131_v24  ;;  %v143_v26 = vadd.f32 %v253_v22, %v137_v25 }
 0x11f   :  { %v147_v27 = vadd.f32 %v143_v26, %v34_v2 }
 0x121   :  { %v149_v28 = vsel %vm31_vm0, %v147_v27, 0.0 }
 0x122   :  { %150 = vadd.xlane.f32.xlu0 %v149_v28 }
 0x124   :  { %v138_v29 = vld [vmem:[#allocation2 + $0x8] sm:$0xff] }
 0x125   :  { %v144_v30 = vadd.f32 %v253_v22, %v138_v29 }
 0x127   :  { %v148_v31 = vadd.f32 %v144_v30, %v35_v3  ;;  %v255_v3 = vld [vmem:[%s363_s6] ss:$0 sm:$0xff] }
 0x129   :  { %v152_v32 = vsel %vm31_vm0, %v148_v31, 0.0 }
 0x12a   :  { %153 = vadd.xlane.f32.xlu0 %v152_v32 }
 0x195   :  { %v151_v40 = vpop.xlane.xlu0 %150 }
 0x196   :  { %v162_v41 = vmul.f32 %v161_v39, %v151_v40 }
 0x198   :  { %v164_v42 = vsub.f32 %v147_v27, %v162_v41 }
 0x19a   :  { %v166_v43 = vmul.f32 %v164_v42, %v164_v42 }
 0x19c   :  { %v168_v44 = vsel %vm31_vm0, %v166_v43, 0.0 }
 0x19d   :  { %169 = vadd.xlane.f32.xlu1 %v168_v44  ;;  %v154_v45 = vpop.xlane.xlu0 %153 }
 0x19e   :  { %v163_v46 = vmul.f32 %v161_v39, %v154_v45 }
 0x1a0   :  { %v165_v47 = vsub.f32 %v148_v31, %v163_v46 }
 0x1a2   :  { %v167_v48 = vmul.f32 %v165_v47, %v165_v47 }
 0x1a4   :  { %v171_v49 = vsel %vm31_vm0, %v167_v48, 0.0 }
 0x1a5   :  { %172 = vadd.xlane.f32.xlu1 %v171_v49 }
 0x210   :  { %v170_v50 = vpop.xlane.xlu1 %169 }
 0x211   :  { %v174_v51 = vmul.f32 %v170_v50, %v161_v39 }
 0x213   :  { %v176_v52 = vadd.f32 1e-05, %v174_v51 }
 0x215   :  { %258 = vrsqrt.f32 %v176_v52  ;;  %vm184_vm4 = vweird.f32 %v176_v52 }
 0x218   :  { %v173_v53 = vpop.xlane.xlu1 %172 }
 0x219   :  { %v175_v54 = vmul.f32 %v173_v53, %v161_v39 }
 0x21b   :  { %v259_v55 = vpop.eup %258  ;;  %v177_v56 = vadd.f32 1e-05, %v175_v54 }
 0x21c   :  { %v179_v57 = vmul.f32 %v259_v55, %v176_v52  ;;  %vm185_vm3 = vweird.f32 %v259_v55 }
 0x21d   :  { %260 = vrsqrt.f32 %v177_v56  ;;  %vm186_vm5 = vmor %vm184_vm4, %vm185_vm3  ;;  %vm194_vm7 = vweird.f32 %v177_v56 }
 0x21e   :  { %v180_v58 = vmul.f32 %v259_v55, %v179_v57 }
 0x220   :  { %v181_v59 = vmul.f32 0.5, %v180_v58 }
 0x222   :  { %v182_v60 = vsub.f32 1.5, %v181_v59 }
 0x223   :  { %v261_v61 = vpop.eup %260 }
 0x224   :  { %v183_v62 = vmul.f32 %v259_v55, %v182_v60  ;;  %v189_v63 = vmul.f32 %v261_v61, %v177_v56  ;;  %vm195_vm6 = vweird.f32 %v261_v61 }
 0x225   :  { %vm196_vm8 = vmor %vm194_vm7, %vm195_vm6 }
 0x226   :  { %v187_v1 = vsel %vm186_vm5, %v259_v55, %v183_v62  ;;  %v190_v2 = vmul.f32 %v261_v61, %v189_v63 }
 0x227   :  { %v198_v4 = vmul.f32 %v187_v1, %v164_v42 }
 0x228   :  { %v191_v5 = vmul.f32 0.5, %v190_v2 }
 0x229   :  { %v204_v6 = vmul.f32 %v254_v0, %v198_v4 }
 0x22a   :  { %v192_v7 = vsub.f32 1.5, %v191_v5 }
 0x22b   :  { %v210_v8 = vadd.f32 %v255_v3, %v204_v6 }
 0x22c   :  { %v193_v9 = vmul.f32 %v261_v61, %v192_v7 }
 0x22d   :  { %212 = vst.msk [vmem:[%s364_s7] sm:$0xff] %vm31_vm0, %v210_v8 }
 0x22e   :  { %v197_v10 = vsel %vm196_vm8, %v261_v61, %v193_v9 }
 0x22f   :  { %v199_v11 = vmul.f32 %v197_v10, %v165_v47 }
 0x231   :  { %v205_v12 = vmul.f32 %v254_v0, %v199_v11 }
 0x233   :  { %v211_v13 = vadd.f32 %v255_v3, %v205_v12 }
 0x235   :  { %213 = vst.msk [vmem:[%s364_s7 + $0x8] sm:$0xff] %vm31_vm0, %v211_v13 }

// kernel: transformer_forward.65
= control target key start
LH: loop header
LB: loop body
LE: loop exit
PB: predicated region body
PF: predicated region fallthrough
CT: control target
= control target key end

     0   :  { %vm20_vm0 = vcmask 490496   ;;  %v140_v1 = vmov 0.0   ;;  %s188_s0 = inlined_call_operand.vmem [shape: f32[16,32], index: 0, kind: input, shape index: {}]   ;;  %s189_s1 = inlined_call_operand.vmem [shape: bf16[32,60], index: 1, kind: input, shape index: {}]   ;;  %s190_s2 = inlined_call_operand.vmem [shape: f32[1,60], index: 2, kind: input, shape index: {}]   ;;  %s191_s3 = inlined_call_operand.hbm [shape: f32[16,60], index: 3, kind: output, shape index: {}]  }
   0x1   :  { %v108_v0 = vld [vmem:[%s189_s1 + $0x8] sm:$0xff]  ;;  %21 = vst.msk [vmem:[#allocation2] sm:$0xff] %vm20_vm0, %v140_v1 }
   0x2   :  { %8 = vsyncpa [#allocation4], 0  ;;  %54 = vmatpush.bf16.msra.mxu0 %v108_v0  ;;  %v107_v2 = vld [vmem:[%s189_s1] sm:$0xff]  ;;  %v26_v4 = vld [vmem:[%s188_s0 + $0x8] sm:$0xff]  ;;  %22 = vst.msk [vmem:[#allocation2 + $0x8] sm:$0xff] %vm20_vm0, %v140_v1  ;;  %vm44_vm1 = vcmask 261120  }
   0x3   :  { %v25_v3 = vld [vmem:[%s188_s0] sm:$0xff]  ;;  %s141_s0 = smov [#allocation3]   ;;  %s86_s24 = sshll.u32 %s191_s3, 4  ;;  %s87_s24 = int_to_ptr.hbm [resolvable:$true] %s86_s24 }
   0x4   :  { %v27_v5 = vpack.c.bf16 %v26_v4, %v25_v3  ;;  %v113_v10 = vld [vmem:[%s190_s2] ss:$0 sm:$0xff]  ;;  %s84_s21 = sshll.u32 %s141_s0, 4  ;;  %s142_s2 = smov 128   ;;  %s85_s21 = int_to_ptr.vmem [resolvable:$true] %s84_s21 }
   0x5   :  { %s143_s25 = smov 8  }
   0x6   :  { %55 = vmatpush.bf16.msra.mxu0 %v107_v2 }
   0x8   :  { %v23_v6 = vld [vmem:[#allocation2] sm:$0xff] }
   0x9   :  { %106 = vmatmul.msk.bf16.vlgmr.msra.gmra.mxu0 %vm44_vm1, %v27_v5  ;;  %v24_v9 = vld [vmem:[#allocation2 + $0x8] sm:$0xff] }
  0x86   :  { %v57_v7 = vpop.f32.mrf.mxu0 }
  0x87   :  { %v62_v8 = vadd.f32 %v57_v7, %v23_v6 }
  0x89   :  { %65 = vst.msk [vmem:[#allocation2] sm:$0xff] %vm20_vm0, %v62_v8 }
  0x8e   :  { %v59_v11 = vpop.f32.mrf.mxu0 }
  0x8f   :  { %v63_v12 = vadd.f32 %v59_v11, %v24_v9 }
  0x90   :  { %v70_v13 = vld [vmem:[#allocation2] sm:$0xff] }
  0x91   :  { %66 = vst.msk [vmem:[#allocation2 + $0x8] sm:$0xff] %vm20_vm0, %v63_v12  ;;  %v76_v14 = vadd.f32 %v113_v10, %v70_v13 }
  0x93   :  { %78 = vst.msk [vmem:[#allocation3] sm:$0xff] %vm20_vm0, %v76_v14 }
  0x98   :  { %v71_v15 = vld [vmem:[#allocation2 + $0x8] sm:$0xff] }
  0x99   :  { %v77_v16 = vadd.f32 %v113_v10, %v71_v15 }
  0x9b   :  { %79 = vst.msk [vmem:[#allocation3 + $0x8] sm:$0xff] %vm20_vm0, %v77_v16 }
  0x9c   :  { %92 = dma.vmem_to_hbm [thread:$0]  %s85_s21, 256, %s87_s24, [#allocation4], %s142_s2, %s142_s2, %s143_s25  }
  0x9d   :  { %138 = dma.done.wait [#allocation4], 256  }
  0x9e   :  { %139 = vsyncadd [#allocation4], 4294967040 }
  0x9f   :  { %97 = vsyncpa [#allocation4], 1 }

// kernel: transformer_forward.50
= control target key start
LH: loop header
LB: loop body
LE: loop exit
PB: predicated region body
PF: predicated region fallthrough
CT: control target
= control target key end

     0   :  { %s778_s15 = smov 0   ;;  %s780_s16 = smov 0   ;;  %s856_s0 = inlined_call_operand.vmem [shape: f32[2,4,8,8], index: 0, kind: input, shape index: {}]   ;;  %s857_s1 = inlined_call_operand.vmem [shape: f32[2,4,8,8], index: 1, kind: input, shape index: {}]   ;;  %s858_s2 = inlined_call_operand.vmem [shape: f32[2,4,8,8], index: 2, kind: input, shape index: {}]   ;;  %s859_s3 = inlined_call_operand.vmem [shape: f32[2,1,8], index: 3, kind: input, shape index: {}]   ;;  %s860_s4 = inlined_call_operand.vmem [shape: f32[2,4,8,8], index: 4, kind: output, shape index: {}]  }
   0x1   :  { %s782_s17 = smov 0   ;;  %s784_s18 = smov 0  }
   0x2   :  { %s786_s19 = smov 0  }
   0x3 LB: > { %s36_s20 = sadd.s32 1, %s740_s17  ;;  %s40_s21 = sadd.s32 1, %s744_s18  ;;  %s748_s19 = sphi %s786_s19, %s14_s19   ;;  %s744_s18 = sphi %s784_s18, %s864_s18   ;;  %s740_s17 = sphi %s782_s17, %s863_s17   ;;  %s736_s16 = sphi %s780_s16, %s862_s16   ;;  %s732_s15 = sphi %s778_s15, %s861_s15  }
   0x4   : > { %p38_p0 = scmp.ge.s32.totalorder %s36_s20, 4  ;;  %p644_p1 = scmp.ge.s32.totalorder %s748_s19, 1 }
   0x5   : > { %p255_p2 = scmp.lt.s32.totalorder %s748_s19, 9 }
   0x6   : > { %s866_s20 = smov (%p38_p0, %s36_s20), 0  ;;  %s868_s21 = smov (!%p38_p0, %s40_s21), %s744_s18 }
   0x7   : > { %p256_p3 = pnand %p644_p1, %p255_p2  ;;  %p42_p4 = scmp.ge.s32.totalorder %s868_s21, 2 }
   0x8   : > { %p321_p5 = scmp.lt.s32.totalorder (!%p256_p3), %s736_s16, 1  ;;  %p323_p6 = scmp.lt.s32.totalorder (!%p256_p3), %s732_s15, 3 }
   0x9   : > { %s870_s21 = smov (%p42_p4, %s868_s21), 0  ;;  %259 = sbr.rel (%p256_p3) target bundleno = 633 (0x279), region = 36 }
   0xe   : > { %s872_s16 = smov (!%p321_p5, %s736_s16), 1  ;;  %s874_s15 = smov (!%p323_p6, %s732_s15), 3  ;;  %vm379_vm0 = vcmask 64512   ;;  %vm376_vm1 = vcmask 7168   ;;  %v750_v5 = vmov -inf   ;;  %v751_v12 = vmov 0  }
   0xf   : > { %s645_s22 = sshll.u32 %s872_s16, 2  ;;  %s359_s7 = scalar_lea.vmem %s859_s3, %s872_s16  ;;  %377 = vst.msk [vmem:[#allocation2] sm:$0xff] %vm376_vm1, %v750_v5  ;;  %700 = vset.pattern.permute.xlu0 %v751_v12  ;;  %701 = vset.pattern.permute.xlu1 %v751_v12  ;;  %v752_v13 = vmov 0.0   ;;  %vm448_vm2 = vcmask 1043456  }
  0x10   : > { %s329_s23 = sadd.s32 %s645_s22, %s874_s15  ;;  %v703_v6 = vld [vmem:[%s359_s7] ss:$0 sm:$0xff]  ;;  %702 = vset.pattern.permute.xlu2 %v751_v12  ;;  %378 = vst.msk [vmem:[#allocation3] sm:$0xff] %vm376_vm1, %v752_v13 }
  0x11   : > { %s808_s24 = sshll.u32 %s329_s23, 3  ;;  %380 = vst.msk [vmem:[#allocation4] sm:$0xff] %vm379_vm0, %v752_v13 }
  0x12   : > { %s342_s27 = scalar_lea.vmem %s857_s1, %s808_s24  ;;  %s331_s30 = scalar_lea.vmem %s856_s0, %s808_s24 }
  0x13   : > { %v383_v0 = vld [vmem:[%s342_s27] sm:$0xff]  ;;  %s353_s10 = scalar_lea.vmem %s858_s2, %s808_s24  ;;  %s370_s13 = scalar_lea.vmem %s860_s4, %s808_s24 }
  0x14   : > { %v384_v1 = vpack.c.bf16 %v383_v0, %v383_v0  ;;  %v381_v3 = vld [vmem:[%s331_s30] sm:$0xff] }
  0x15   : > { %v382_v4 = vpack.c.bf16 %v381_v3, %v381_v3  ;;  %v443_v18 = vld [vmem:[%s353_s10] sm:$0xff] }
  0x16   : > { %v390_v2 = vsel %vm379_vm0, %v384_v1, 0  ;;  %v411_v14 = vld [vmem:[#allocation2] sm:$0xff]  ;;  %v444_v19 = vpack.c.bf16 %v443_v18, %v443_v18 }
  0x17   : > { %399 = vmatpush.bf16.xpose.msra.mxu0 %v390_v2  ;;  %v427_v29 = vld [vmem:[#allocation3] sm:$0xff] }
  0x18   : > { %v450_v20 = vsel %vm448_vm2, %v444_v19, 0  ;;  %v435_v37 = vld [vmem:[#allocation4] sm:$0xff] }
  0x19   : > { %459 = vmatpush.bf16.msra.mxu1 %v450_v20 }
  0x1e   : > { %653 = vmatmul.msk.bf16.vlgmr.msra.gmra.mxu0 %vm379_vm0, %v382_v4 }
  0x9b   : > { %v401_v7 = vpop.f32.mrf.mxu0 }
  0x9c   : > { %v405_v8 = vmul.f32 0.35355338, %v401_v7 }
  0x9e   : > { %v410_v9 = vadd.f32 %v703_v6, %v405_v8 }
  0xa0   : > { %v412_v10 = vsel %vm379_vm0, %v410_v9, -inf }
  0xa1   : > { %413 = vmax.xlane.f32.xlu0 %v412_v10 }
  0xa3   : > { %v403_v11 = vpop.f32.mrf.mxu0 }
 0x114   : > { %v414_v15 = vpop.xlane.xlu0 %413 }
 0x115   : > { %v415_v16 = vmax.f32 %v411_v14, %v414_v15 }
 0x117   : > { %v416_v17 = vsub.f32 %v411_v14, %v415_v16  ;;  %467 = vst.msk [vmem:[#allocation2] sm:$0xff] %vm376_vm1, %v415_v16  ;;  %421 = vperm.xlu0 %700, %v415_v16  }
 0x119   : > { %v417_v27 = vmul.f32 1.442695, %v416_v17 }
 0x189   : > { %v422_v21 = vpop.permute.xlu0 %421 }
 0x18a   : > { %v424_v22 = vsub.f32 %v410_v9, %v422_v21 }
 0x18c   : > { %v425_v23 = vmul.f32 1.442695, %v424_v22 }
 0x18e   : > { %704 = vpow2.f32 %v425_v23 }
 0x18f   : > { %706 = vpow2.f32 %v417_v27 }
 0x194   : > { %v705_v24 = vpop.eup %704 }
 0x195   : > { %v429_v25 = vsel %vm379_vm0, %v705_v24, 0.0  ;;  %v442_v26 = vpack.c.bf16 %v705_v24, %v705_v24  ;;  %v707_v28 = vpop.eup %706 }
 0x196   : > { %430 = vadd.xlane.f32.xlu1 %v429_v25  ;;  %v428_v30 = vmul.f32 %v707_v28, %v427_v29 }
 0x197   : > { %654 = vmatmul.msk.bf16.vlgmr.msra.gmra.mxu1 %vm379_vm0, %v442_v26 }
 0x1af   : > { %438 = vperm.xlu1 %701, %v707_v28  }
 0x209   : > { %v431_v31 = vpop.xlane.xlu1 %430 }
 0x20a   : > { %v432_v32 = vadd.f32 %v431_v31, %v428_v30 }
 0x20c   : > { %434 = vst.msk [vmem:[#allocation3] sm:$0xff] %vm376_vm1, %v432_v32 }
 0x213   : > { %v472_v33 = vld [vmem:[#allocation3] sm:$0xff] }
 0x214   : > { %v461_v34 = vpop.f32.mrf.mxu1  ;;  %708 = vrcp.f32 %v472_v33 }
 0x21a   : > { %v709_v35 = vpop.eup %708 }
 0x21b   : > { %476 = vperm.xlu2 %702, %v709_v35  }
 0x21c   : > { %v463_v36 = vpop.f32.mrf.mxu1 }
 0x221   : > { %v439_v38 = vpop.permute.xlu1 %438 }
 0x222   : > { %v441_v39 = vmul.f32 %v439_v38, %v435_v37 }
 0x224   : > { %v465_v40 = vadd.f32 %v461_v34, %v441_v39 }
 0x226   : > { %466 = vst.msk [vmem:[#allocation4] sm:$0xff] %vm379_vm0, %v465_v40 }
 0x22d   : > { %v471_v41 = vld [vmem:[#allocation4] sm:$0xff] }
 0x275   : > { %v477_v42 = vpop.permute.xlu2 %476 }
 0x276   : > { %v479_v43 = vmul.f32 %v477_v42, %v471_v41 }
 0x278   : > { %480 = vst.msk [vmem:[%s370_s13] sm:$0xff] %vm379_vm0, %v479_v43 }
 0x279 PF: > { %s14_s19 = sadd.s32 1, %s748_s19   ;;  %s861_s15 = smov %s740_s17 }
 0x27a   : > { %p11_p7 = scmp.ge.s32.totalorder %s14_s19, 10   ;;  %s862_s16 = smov %s744_s18 }
 0x27b   : > { %s863_s17 = smov %s866_s20  ;;  %s864_s18 = smov %s870_s21 }
 0x27c   :  { %13 = sbr.rel (!%p11_p7) target bundleno = 3 (0x3), region = 83 }

</bundles_post_ra>
